<compile_context>
chip_gen: v6e
topology: v6e:2x2x1
jax: 0.10.0
libtpu: 0.0.40
codegen_flags: <defaults>
</compile_context>

<pallas_src>
import functools

import jax
import jax.numpy as jnp
from jax import lax
from jax.experimental import pallas as pl
from jax.experimental.pallas import tpu as pltpu


def _round_up(v, m):
    return (v + m - 1) // m * m


def _sk_kernel(x_ref, wall_ref, bconv_ref, wexc_ref, bexc_ref, o_ref,
               xpad_ref, xshift_ref, *, kernels, H, W, pad):
    C = x_ref.shape[1]
    HW = H * W
    K = len(kernels)
    rmax = max(kernels) // 2
    n_taps = (2 * rmax + 1) ** 2
    TC = n_taps * C
    TCpad = xshift_ref.shape[0]

    # ---- 1. zero-padded, flattened copy of this image in VMEM: every spatial tap
    #         becomes a static lane slice of this buffer (out-of-image reads zeros).
    xpad_ref[...] = jnp.zeros(xpad_ref.shape, xpad_ref.dtype)
    xpad_ref[:, pad:pad + HW] = x_ref[0]

    # ---- 2. build the stacked shifted-image matrix (one (C, HW) slab per tap).
    #         Horizontal taps that would wrap into the neighbouring row are masked.
    col = lax.broadcasted_iota(jnp.int32, (C, HW), 1) % W
    masks = {dx: jnp.logical_and(col + dx >= 0, col + dx < W)
             for dx in range(-rmax, rmax + 1) if dx != 0}
    t = 0
    for dy in range(-rmax, rmax + 1):
        for dx in range(-rmax, rmax + 1):
            start = pad + dy * W + dx
            xs = xpad_ref[:, start:start + HW]                 # (C, HW)
            if dx != 0:
                xs = jnp.where(masks[dx], xs, jnp.zeros_like(xs))
            xshift_ref[t * C:(t + 1) * C, :] = xs
            t += 1
    if TCpad > TC:   # padded contraction rows must be zero (weights there are zero too)
        xshift_ref[TC:, :] = jnp.zeros((TCpad - TC, HW), xshift_ref.dtype)

    # ---- 3. ALL branches x ALL taps in ONE MXU dot; folded conv+BN bias; ReLU.
    feats = jnp.dot(wall_ref[...], xshift_ref[...],
                    preferred_element_type=jnp.float32)         # (K*C, HW)
    feats = jnp.maximum(feats + bconv_ref[...], 0.0)

    # ---- 4. squeeze (lane sum; the 1/HW of the GAP is folded into wexc) + excite
    #         (fc and fcs are linear with no activation in between -> pre-composed).
    U = feats[0:C]
    for b in range(1, K):
        U = U + feats[b * C:(b + 1) * C]
    s = jnp.sum(U, axis=1, keepdims=True)                       # (C, 1)
    logits = jnp.dot(wexc_ref[...], s,
                     preferred_element_type=jnp.float32) + bexc_ref[...]   # (K*C, 1)

    # ---- 5. softmax over the branch axis, kept as K small (C, 1) slices.
    m = logits[0:C]
    for b in range(1, K):
        m = jnp.maximum(m, logits[b * C:(b + 1) * C])
    exps = [jnp.exp(logits[b * C:(b + 1) * C] - m) for b in range(K)]
    denom = exps[0]
    for b in range(1, K):
        denom = denom + exps[b]
    inv = 1.0 / denom

    # ---- 6. select: attention-weighted sum of branch features (lane-dense store).
    V = (exps[0] * inv) * feats[0:C]
    for b in range(1, K):
        V = V + (exps[b] * inv) * feats[b * C:(b + 1) * C]
    o_ref[0] = V.astype(o_ref.dtype)


def sk_attention(x, conv_ws, conv_bs, bn_gamma, bn_beta, bn_mean, bn_var,
                 wfc, bfc, wfcs, bfcs, *, kernels=(1, 3, 5, 7), eps=1e-5):
    """x: (N, C, H, W) NCHW. conv_ws[b]: (C, C, k_b, k_b). Linear weights in PyTorch layout."""
    N, C, H, W = x.shape
    HW = H * W
    K = len(kernels)
    rmax = max(kernels) // 2
    taps = [(dy, dx) for dy in range(-rmax, rmax + 1) for dx in range(-rmax, rmax + 1)]
    T = len(taps)
    TC = T * C
    TCpad = _round_up(TC, 128)
    f32 = jnp.float32

    # ---- fold conv bias + inference BatchNorm, and stack every branch & tap into one
    #      (K*C, T*C) matrix (zeros where a branch's kernel does not cover a tap) ----
    row_blocks, bconv_list = [], []
    for b, k in enumerate(kernels):
        r = k // 2
        scale = (bn_gamma[b] / jnp.sqrt(bn_var[b] + eps)).astype(f32)       # (C,)
        wf = conv_ws[b].astype(f32) * scale[:, None, None, None]            # (C, C, k, k)
        bf = (conv_bs[b] - bn_mean[b]) * scale + bn_beta[b]                  # (C,)
        blocks = []
        for (dy, dx) in taps:
            if abs(dy) <= r and abs(dx) <= r:
                blocks.append(wf[:, :, dy + r, dx + r])                      # (C_out, C_in)
            else:
                blocks.append(jnp.zeros((C, C), f32))
        row_blocks.append(jnp.concatenate(blocks, axis=1))                   # (C, T*C)
        bconv_list.append(bf.astype(f32))
    wall = jnp.concatenate(row_blocks, axis=0)                               # (K*C, T*C)
    wall = jnp.pad(wall, ((0, 0), (0, TCpad - TC)))                          # pad contraction
    bconv = jnp.concatenate(bconv_list, axis=0)[:, None]                     # (K*C, 1)

    # ---- pre-compose the excite path: logits_b = fcs_b(fc(S)); fold the GAP's 1/HW ----
    wexc = jnp.concatenate([wfcs[b].astype(f32) @ wfc.astype(f32) for b in range(K)],
                           axis=0) / HW                                      # (K*C, C)
    bexc = jnp.concatenate([wfcs[b].astype(f32) @ bfc.astype(f32) + bfcs[b].astype(f32)
                            for b in range(K)], axis=0)[:, None]             # (K*C, 1)

    # Free reshape: pixel axis last (lane dim). No transposes/pads of x in HBM.
    xf = x.reshape(N, C, HW)
    pad = _round_up(rmax * W + rmax, 128)   # left/right zero pad of the flat image

    kernel = functools.partial(_sk_kernel, kernels=tuple(kernels), H=H, W=W, pad=pad)

    out = pl.pallas_call(
        kernel,
        out_shape=jax.ShapeDtypeStruct((N, C, HW), x.dtype),
        grid_spec=pltpu.PrefetchScalarGridSpec(
            num_scalar_prefetch=0,
            grid=(N,),
            in_specs=[
                pl.BlockSpec((1, C, HW), lambda n: (n, 0, 0)),     # image n (lane-dense)
                pl.BlockSpec((K * C, TCpad), lambda n: (0, 0)),    # all conv taps, BN folded
                pl.BlockSpec((K * C, 1), lambda n: (0, 0)),        # folded conv+BN bias
                pl.BlockSpec((K * C, C), lambda n: (0, 0)),        # pre-composed excite weight
                pl.BlockSpec((K * C, 1), lambda n: (0, 0)),        # pre-composed excite bias
            ],
            out_specs=pl.BlockSpec((1, C, HW), lambda n: (n, 0, 0)),
            scratch_shapes=[
                pltpu.VMEM((C, HW + 2 * pad), x.dtype),            # zero-padded flat image
                pltpu.VMEM((TCpad, HW), x.dtype),                  # stacked shifted images
            ],
        ),
        compiler_params=pltpu.CompilerParams(
            dimension_semantics=("parallel",)),                    # megacore over batch
    )(xf, wall, bconv, wexc, bexc)

    return out.reshape(N, C, H, W)


def sk_attention_reference(x, conv_ws, conv_bs, bn_gamma, bn_beta, bn_mean, bn_var,
                           wfc, bfc, wfcs, bfcs, kernels=(1, 3, 5, 7), eps=1e-5):
    """Pure-JAX reference of the PyTorch module (inference BN)."""
    K = len(kernels)
    feats = []
    for b, k in enumerate(kernels):
        p = k // 2
        y = lax.conv_general_dilated(
            x, conv_ws[b], window_strides=(1, 1),
            padding=[(p, p), (p, p)],
            dimension_numbers=("NCHW", "OIHW", "NCHW"))
        y = y + conv_bs[b][None, :, None, None]
        y = (y - bn_mean[b][None, :, None, None]) * (
            bn_gamma[b][None, :, None, None]
            / jnp.sqrt(bn_var[b][None, :, None, None] + eps)) + bn_beta[b][None, :, None, None]
        feats.append(jnp.maximum(y, 0.0))
    U = sum(feats)
    S = U.mean(axis=(2, 3))                                              # (N, C)
    Z = S @ wfc.T + bfc                                                  # (N, d)
    logits = jnp.stack([Z @ wfcs[b].T + bfcs[b] for b in range(K)], 0)   # (K, N, C)
    attn = jax.nn.softmax(logits, axis=0)
    return sum(attn[b][:, :, None, None] * feats[b] for b in range(K))


if __name__ == "__main__":
    key = jax.random.PRNGKey(0)
    keys = iter(jax.random.split(key, 64))

    N, C, H, W = 2, 4, 16, 16
    kernels = (1, 3, 5, 7)
    reduction, L = 16, 32
    d = max(L, C // reduction)   # 32, as in the PyTorch module
    K = len(kernels)

    conv_ws, conv_bs = [], []
    bn_gamma, bn_beta, bn_mean, bn_var = [], [], [], []
    for k in kernels:
        conv_ws.append(jax.random.normal(next(keys), (C, C, k, k), jnp.float32) * (0.5 / k))
        conv_bs.append(jax.random.normal(next(keys), (C,), jnp.float32) * 0.1)
        bn_gamma.append(1.0 + 0.1 * jax.random.normal(next(keys), (C,), jnp.float32))
        bn_beta.append(0.1 * jax.random.normal(next(keys), (C,), jnp.float32))
        bn_mean.append(0.1 * jax.random.normal(next(keys), (C,), jnp.float32))
        bn_var.append(jax.random.uniform(next(keys), (C,), jnp.float32, 0.5, 1.5))

    wfc = jax.random.normal(next(keys), (d, C), jnp.float32) * 0.3
    bfc = jax.random.normal(next(keys), (d,), jnp.float32) * 0.1
    wfcs = [jax.random.normal(next(keys), (C, d), jnp.float32) * 0.3 for _ in kernels]
    bfcs = [jax.random.normal(next(keys), (C,), jnp.float32) * 0.1 for _ in kernels]

    x = jax.random.normal(next(keys), (N, C, H, W), jnp.float32)

    y = sk_attention(x, conv_ws, conv_bs, bn_gamma, bn_beta, bn_mean, bn_var,
                     wfc, bfc, wfcs, bfcs, kernels=kernels)
    jax.block_until_ready(y)

    y_ref = sk_attention_reference(x, conv_ws, conv_bs, bn_gamma, bn_beta, bn_mean, bn_var,
                                   wfc, bfc, wfcs, bfcs, kernels=kernels)
    assert y.shape == (N, C, H, W)
    err = float(jnp.max(jnp.abs(y - y_ref)))
    assert jnp.allclose(y, y_ref, atol=2e-3, rtol=2e-3), f"mismatch vs reference: {err}"

    print("KERNEL_OK")
</pallas_src>

<mosaic_0001>
module attributes {stable_mosaic.version = 11 : i64} {
  func.func @_sk_kernel(%arg0: i32, %arg1: memref<1x4x256xf32, #tpu.memory_space<vmem>>, %arg2: memref<16x256xf32, #tpu.memory_space<vmem>>, %arg3: memref<16x1xf32, #tpu.memory_space<vmem>>, %arg4: memref<16x4xf32, #tpu.memory_space<vmem>>, %arg5: memref<16x1xf32, #tpu.memory_space<vmem>>, %arg6: memref<1x4x256xf32, #tpu.memory_space<vmem>>, %arg7: memref<4x512xf32, #tpu.memory_space<vmem>>, %arg8: memref<256x256xf32, #tpu.memory_space<vmem>>) attributes {dimension_semantics = [#tpu.dimension_semantics<parallel>], iteration_bounds = array<i64: 2>, scalar_prefetch = 0 : i64, scratch_operands = 2 : i64, tpu.core_type = #tpu.core_type<tc>, window_params = [{transform_indices = @transform_0, window_bounds = array<i64: 1, 4, 256>}, {pipeline_mode = #tpu.pipeline_mode<synchronous>, transform_indices = @transform_1, window_bounds = array<i64: 16, 256>}, {pipeline_mode = #tpu.pipeline_mode<synchronous>, transform_indices = @transform_2, window_bounds = array<i64: 16, 1>}, {pipeline_mode = #tpu.pipeline_mode<synchronous>, transform_indices = @transform_3, window_bounds = array<i64: 16, 4>}, {pipeline_mode = #tpu.pipeline_mode<synchronous>, transform_indices = @transform_4, window_bounds = array<i64: 16, 1>}, {transform_indices = @transform_5, window_bounds = array<i64: 1, 4, 256>}]} {
    %cst = arith.constant 0.000000e+00 : f32
    %0 = vector.broadcast %cst : f32 to vector<4x512xf32>
    %c0 = arith.constant 0 : index
    %c0_0 = arith.constant 0 : index
    %1 = vector.load %arg7[%c0, %c0_0] : memref<4x512xf32, #tpu.memory_space<vmem>>, vector<4x512xf32>
    tpu.vector_store %arg7[%c0, %c0_0], %0 {strides = array<i32>} : memref<4x512xf32, #tpu.memory_space<vmem>>, vector<4x512xf32>,
    %c0_1 = arith.constant 0 : index
    %c0_2 = arith.constant 0 : index
    %c0_3 = arith.constant 0 : index
    %2 = vector.load %arg1[%c0_1, %c0_2, %c0_3] : memref<1x4x256xf32, #tpu.memory_space<vmem>>, vector<1x4x256xf32>
    %3 = vector.shape_cast %2 : vector<1x4x256xf32> to vector<4x256xf32>
    %c0_4 = arith.constant 0 : index
    %c128 = arith.constant 128 : index
    %4 = vector.load %arg7[%c0_4, %c128] : memref<4x512xf32, #tpu.memory_space<vmem>>, vector<4x256xf32>
    tpu.vector_store %arg7[%c0_4, %c128], %3 {strides = array<i32>} : memref<4x512xf32, #tpu.memory_space<vmem>>, vector<4x256xf32>,
    %5 = tpu.iota {dimensions = array<i32: 1>} : vector<4x256xi32>
    %c16_i32 = arith.constant 16 : i32
    %c0_i32 = arith.constant 0 : i32
    %6 = arith.cmpi eq, %c16_i32, %c0_i32 : i32
    %c1_i32 = arith.constant 1 : i32
    %7 = arith.select %6, %c1_i32, %c16_i32 : i32
    %8 = vector.broadcast %7 : i32 to vector<4x256xi32>
    %9 = arith.remsi %5, %8 : vector<4x256xi32>
    %c0_i32_5 = arith.constant 0 : i32
    %10 = vector.broadcast %c0_i32_5 : i32 to vector<4x256xi32>
    %11 = arith.cmpi ne, %9, %10 : vector<4x256xi32>
    %c0_i32_6 = arith.constant 0 : i32
    %12 = vector.broadcast %c0_i32_6 : i32 to vector<4x256xi32>
    %13 = arith.cmpi slt, %9, %12 : vector<4x256xi32>
    %c0_i32_7 = arith.constant 0 : i32
    %14 = arith.cmpi slt, %7, %c0_i32_7 : i32
    %15 = vector.broadcast %14 : i1 to vector<4x256xi1>
    %16 = vector.broadcast %15 : vector<4x256xi1> to vector<4x256xi1>
    %17 = arith.xori %13, %16 : vector<4x256xi1>
    %18 = arith.andi %17, %11 : vector<4x256xi1>
    %19 = vector.broadcast %7 : i32 to vector<4x256xi32>
    %20 = arith.addi %9, %19 : vector<4x256xi32>
    %21 = arith.select %18, %20, %9 : vector<4x256xi1>, vector<4x256xi32>
    %c-3_i32 = arith.constant -3 : i32
    %22 = vector.broadcast %c-3_i32 : i32 to vector<4x256xi32>
    %23 = arith.addi %21, %22 : vector<4x256xi32>
    %c0_i32_8 = arith.constant 0 : i32
    %24 = vector.broadcast %c0_i32_8 : i32 to vector<4x256xi32>
    %25 = arith.cmpi sge, %23, %24 : vector<4x256xi32>
    %c-3_i32_9 = arith.constant -3 : i32
    %26 = vector.broadcast %c-3_i32_9 : i32 to vector<4x256xi32>
    %27 = arith.addi %21, %26 : vector<4x256xi32>
    %c16_i32_10 = arith.constant 16 : i32
    %28 = vector.broadcast %c16_i32_10 : i32 to vector<4x256xi32>
    %29 = arith.cmpi slt, %27, %28 : vector<4x256xi32>
    %30 = arith.andi %25, %29 : vector<4x256xi1>
    %c-2_i32 = arith.constant -2 : i32
    %31 = vector.broadcast %c-2_i32 : i32 to vector<4x256xi32>
    %32 = arith.addi %21, %31 : vector<4x256xi32>
    %c0_i32_11 = arith.constant 0 : i32
    %33 = vector.broadcast %c0_i32_11 : i32 to vector<4x256xi32>
    %34 = arith.cmpi sge, %32, %33 : vector<4x256xi32>
    %c-2_i32_12 = arith.constant -2 : i32
    %35 = vector.broadcast %c-2_i32_12 : i32 to vector<4x256xi32>
    %36 = arith.addi %21, %35 : vector<4x256xi32>
    %c16_i32_13 = arith.constant 16 : i32
    %37 = vector.broadcast %c16_i32_13 : i32 to vector<4x256xi32>
    %38 = arith.cmpi slt, %36, %37 : vector<4x256xi32>
    %39 = arith.andi %34, %38 : vector<4x256xi1>
    %c-1_i32 = arith.constant -1 : i32
    %40 = vector.broadcast %c-1_i32 : i32 to vector<4x256xi32>
    %41 = arith.addi %21, %40 : vector<4x256xi32>
    %c0_i32_14 = arith.constant 0 : i32
    %42 = vector.broadcast %c0_i32_14 : i32 to vector<4x256xi32>
    %43 = arith.cmpi sge, %41, %42 : vector<4x256xi32>
    %c-1_i32_15 = arith.constant -1 : i32
    %44 = vector.broadcast %c-1_i32_15 : i32 to vector<4x256xi32>
    %45 = arith.addi %21, %44 : vector<4x256xi32>
    %c16_i32_16 = arith.constant 16 : i32
    %46 = vector.broadcast %c16_i32_16 : i32 to vector<4x256xi32>
    %47 = arith.cmpi slt, %45, %46 : vector<4x256xi32>
    %48 = arith.andi %43, %47 : vector<4x256xi1>
    %c1_i32_17 = arith.constant 1 : i32
    %49 = vector.broadcast %c1_i32_17 : i32 to vector<4x256xi32>
    %50 = arith.addi %21, %49 : vector<4x256xi32>
    %c0_i32_18 = arith.constant 0 : i32
    %51 = vector.broadcast %c0_i32_18 : i32 to vector<4x256xi32>
    %52 = arith.cmpi sge, %50, %51 : vector<4x256xi32>
    %c1_i32_19 = arith.constant 1 : i32
    %53 = vector.broadcast %c1_i32_19 : i32 to vector<4x256xi32>
    %54 = arith.addi %21, %53 : vector<4x256xi32>
    %c16_i32_20 = arith.constant 16 : i32
    %55 = vector.broadcast %c16_i32_20 : i32 to vector<4x256xi32>
    %56 = arith.cmpi slt, %54, %55 : vector<4x256xi32>
    %57 = arith.andi %52, %56 : vector<4x256xi1>
    %c2_i32 = arith.constant 2 : i32
    %58 = vector.broadcast %c2_i32 : i32 to vector<4x256xi32>
    %59 = arith.addi %21, %58 : vector<4x256xi32>
    %c0_i32_21 = arith.constant 0 : i32
    %60 = vector.broadcast %c0_i32_21 : i32 to vector<4x256xi32>
    %61 = arith.cmpi sge, %59, %60 : vector<4x256xi32>
    %c2_i32_22 = arith.constant 2 : i32
    %62 = vector.broadcast %c2_i32_22 : i32 to vector<4x256xi32>
    %63 = arith.addi %21, %62 : vector<4x256xi32>
    %c16_i32_23 = arith.constant 16 : i32
    %64 = vector.broadcast %c16_i32_23 : i32 to vector<4x256xi32>
    %65 = arith.cmpi slt, %63, %64 : vector<4x256xi32>
    %66 = arith.andi %61, %65 : vector<4x256xi1>
    %c3_i32 = arith.constant 3 : i32
    %67 = vector.broadcast %c3_i32 : i32 to vector<4x256xi32>
    %68 = arith.addi %21, %67 : vector<4x256xi32>
    %c0_i32_24 = arith.constant 0 : i32
    %69 = vector.broadcast %c0_i32_24 : i32 to vector<4x256xi32>
    %70 = arith.cmpi sge, %68, %69 : vector<4x256xi32>
    %c3_i32_25 = arith.constant 3 : i32
    %71 = vector.broadcast %c3_i32_25 : i32 to vector<4x256xi32>
    %72 = arith.addi %21, %71 : vector<4x256xi32>
    %c16_i32_26 = arith.constant 16 : i32
    %73 = vector.broadcast %c16_i32_26 : i32 to vector<4x256xi32>
    %74 = arith.cmpi slt, %72, %73 : vector<4x256xi32>
    %75 = arith.andi %70, %74 : vector<4x256xi1>
    %c0_27 = arith.constant 0 : index
    %c77 = arith.constant 77 : index
    %76 = vector.load %arg7[%c0_27, %c77] : memref<4x512xf32, #tpu.memory_space<vmem>>, vector<4x256xf32>
    %cst_28 = arith.constant 0.000000e+00 : f32
    %77 = vector.broadcast %cst_28 : f32 to vector<4x256xf32>
    %78 = arith.select %30, %76, %77 : vector<4x256xi1>, vector<4x256xf32>
    %c0_29 = arith.constant 0 : index
    %c0_30 = arith.constant 0 : index
    %79 = vector.load %arg8[%c0_29, %c0_30] : memref<256x256xf32, #tpu.memory_space<vmem>>, vector<4x256xf32>
    tpu.vector_store %arg8[%c0_29, %c0_30], %78 {strides = array<i32>} : memref<256x256xf32, #tpu.memory_space<vmem>>, vector<4x256xf32>,
    %c0_31 = arith.constant 0 : index
    %c78 = arith.constant 78 : index
    %80 = vector.load %arg7[%c0_31, %c78] : memref<4x512xf32, #tpu.memory_space<vmem>>, vector<4x256xf32>
    %cst_32 = arith.constant 0.000000e+00 : f32
    %81 = vector.broadcast %cst_32 : f32 to vector<4x256xf32>
    %82 = arith.select %39, %80, %81 : vector<4x256xi1>, vector<4x256xf32>
    %c4 = arith.constant 4 : index
    %c0_33 = arith.constant 0 : index
    %83 = vector.load %arg8[%c4, %c0_33] : memref<256x256xf32, #tpu.memory_space<vmem>>, vector<4x256xf32>
    tpu.vector_store %arg8[%c4, %c0_33], %82 {strides = array<i32>} : memref<256x256xf32, #tpu.memory_space<vmem>>, vector<4x256xf32>,
    %c0_34 = arith.constant 0 : index
    %c79 = arith.constant 79 : index
    %84 = vector.load %arg7[%c0_34, %c79] : memref<4x512xf32, #tpu.memory_space<vmem>>, vector<4x256xf32>
    %cst_35 = arith.constant 0.000000e+00 : f32
    %85 = vector.broadcast %cst_35 : f32 to vector<4x256xf32>
    %86 = arith.select %48, %84, %85 : vector<4x256xi1>, vector<4x256xf32>
    %c8 = arith.constant 8 : index
    %c0_36 = arith.constant 0 : index
    %87 = vector.load %arg8[%c8, %c0_36] : memref<256x256xf32, #tpu.memory_space<vmem>>, vector<4x256xf32>
    tpu.vector_store %arg8[%c8, %c0_36], %86 {strides = array<i32>} : memref<256x256xf32, #tpu.memory_space<vmem>>, vector<4x256xf32>,
    %c0_37 = arith.constant 0 : index
    %c80 = arith.constant 80 : index
    %88 = vector.load %arg7[%c0_37, %c80] : memref<4x512xf32, #tpu.memory_space<vmem>>, vector<4x256xf32>
    %c12 = arith.constant 12 : index
    %c0_38 = arith.constant 0 : index
    %89 = vector.load %arg8[%c12, %c0_38] : memref<256x256xf32, #tpu.memory_space<vmem>>, vector<4x256xf32>
    tpu.vector_store %arg8[%c12, %c0_38], %88 {strides = array<i32>} : memref<256x256xf32, #tpu.memory_space<vmem>>, vector<4x256xf32>,
    %c0_39 = arith.constant 0 : index
    %c81 = arith.constant 81 : index
    %90 = vector.load %arg7[%c0_39, %c81] : memref<4x512xf32, #tpu.memory_space<vmem>>, vector<4x256xf32>
    %cst_40 = arith.constant 0.000000e+00 : f32
    %91 = vector.broadcast %cst_40 : f32 to vector<4x256xf32>
    %92 = arith.select %57, %90, %91 : vector<4x256xi1>, vector<4x256xf32>
    %c16 = arith.constant 16 : index
    %c0_41 = arith.constant 0 : index
    %93 = vector.load %arg8[%c16, %c0_41] : memref<256x256xf32, #tpu.memory_space<vmem>>, vector<4x256xf32>
    tpu.vector_store %arg8[%c16, %c0_41], %92 {strides = array<i32>} : memref<256x256xf32, #tpu.memory_space<vmem>>, vector<4x256xf32>,
    %c0_42 = arith.constant 0 : index
    %c82 = arith.constant 82 : index
    %94 = vector.load %arg7[%c0_42, %c82] : memref<4x512xf32, #tpu.memory_space<vmem>>, vector<4x256xf32>
    %cst_43 = arith.constant 0.000000e+00 : f32
    %95 = vector.broadcast %cst_43 : f32 to vector<4x256xf32>
    %96 = arith.select %66, %94, %95 : vector<4x256xi1>, vector<4x256xf32>
    %c20 = arith.constant 20 : index
    %c0_44 = arith.constant 0 : index
    %97 = vector.load %arg8[%c20, %c0_44] : memref<256x256xf32, #tpu.memory_space<vmem>>, vector<4x256xf32>
    tpu.vector_store %arg8[%c20, %c0_44], %96 {strides = array<i32>} : memref<256x256xf32, #tpu.memory_space<vmem>>, vector<4x256xf32>,
    %c0_45 = arith.constant 0 : index
    %c83 = arith.constant 83 : index
    %98 = vector.load %arg7[%c0_45, %c83] : memref<4x512xf32, #tpu.memory_space<vmem>>, vector<4x256xf32>
    %cst_46 = arith.constant 0.000000e+00 : f32
    %99 = vector.broadcast %cst_46 : f32 to vector<4x256xf32>
    %100 = arith.select %75, %98, %99 : vector<4x256xi1>, vector<4x256xf32>
    %c24 = arith.constant 24 : index
    %c0_47 = arith.constant 0 : index
    %101 = vector.load %arg8[%c24, %c0_47] : memref<256x256xf32, #tpu.memory_space<vmem>>, vector<4x256xf32>
    tpu.vector_store %arg8[%c24, %c0_47], %100 {strides = array<i32>} : memref<256x256xf32, #tpu.memory_space<vmem>>, vector<4x256xf32>,
    %c0_48 = arith.constant 0 : index
    %c93 = arith.constant 93 : index
    %102 = vector.load %arg7[%c0_48, %c93] : memref<4x512xf32, #tpu.memory_space<vmem>>, vector<4x256xf32>
    %cst_49 = arith.constant 0.000000e+00 : f32
    %103 = vector.broadcast %cst_49 : f32 to vector<4x256xf32>
    %104 = arith.select %30, %102, %103 : vector<4x256xi1>, vector<4x256xf32>
    %c28 = arith.constant 28 : index
    %c0_50 = arith.constant 0 : index
    %105 = vector.load %arg8[%c28, %c0_50] : memref<256x256xf32, #tpu.memory_space<vmem>>, vector<4x256xf32>
    tpu.vector_store %arg8[%c28, %c0_50], %104 {strides = array<i32>} : memref<256x256xf32, #tpu.memory_space<vmem>>, vector<4x256xf32>,
    %c0_51 = arith.constant 0 : index
    %c94 = arith.constant 94 : index
    %106 = vector.load %arg7[%c0_51, %c94] : memref<4x512xf32, #tpu.memory_space<vmem>>, vector<4x256xf32>
    %cst_52 = arith.constant 0.000000e+00 : f32
    %107 = vector.broadcast %cst_52 : f32 to vector<4x256xf32>
    %108 = arith.select %39, %106, %107 : vector<4x256xi1>, vector<4x256xf32>
    %c32 = arith.constant 32 : index
    %c0_53 = arith.constant 0 : index
    %109 = vector.load %arg8[%c32, %c0_53] : memref<256x256xf32, #tpu.memory_space<vmem>>, vector<4x256xf32>
    tpu.vector_store %arg8[%c32, %c0_53], %108 {strides = array<i32>} : memref<256x256xf32, #tpu.memory_space<vmem>>, vector<4x256xf32>,
    %c0_54 = arith.constant 0 : index
    %c95 = arith.constant 95 : index
    %110 = vector.load %arg7[%c0_54, %c95] : memref<4x512xf32, #tpu.memory_space<vmem>>, vector<4x256xf32>
    %cst_55 = arith.constant 0.000000e+00 : f32
    %111 = vector.broadcast %cst_55 : f32 to vector<4x256xf32>
    %112 = arith.select %48, %110, %111 : vector<4x256xi1>, vector<4x256xf32>
    %c36 = arith.constant 36 : index
    %c0_56 = arith.constant 0 : index
    %113 = vector.load %arg8[%c36, %c0_56] : memref<256x256xf32, #tpu.memory_space<vmem>>, vector<4x256xf32>
    tpu.vector_store %arg8[%c36, %c0_56], %112 {strides = array<i32>} : memref<256x256xf32, #tpu.memory_space<vmem>>, vector<4x256xf32>,
    %c0_57 = arith.constant 0 : index
    %c96 = arith.constant 96 : index
    %114 = vector.load %arg7[%c0_57, %c96] : memref<4x512xf32, #tpu.memory_space<vmem>>, vector<4x256xf32>
    %c40 = arith.constant 40 : index
    %c0_58 = arith.constant 0 : index
    %115 = vector.load %arg8[%c40, %c0_58] : memref<256x256xf32, #tpu.memory_space<vmem>>, vector<4x256xf32>
    tpu.vector_store %arg8[%c40, %c0_58], %114 {strides = array<i32>} : memref<256x256xf32, #tpu.memory_space<vmem>>, vector<4x256xf32>,
    %c0_59 = arith.constant 0 : index
    %c97 = arith.constant 97 : index
    %116 = vector.load %arg7[%c0_59, %c97] : memref<4x512xf32, #tpu.memory_space<vmem>>, vector<4x256xf32>
    %cst_60 = arith.constant 0.000000e+00 : f32
    %117 = vector.broadcast %cst_60 : f32 to vector<4x256xf32>
    %118 = arith.select %57, %116, %117 : vector<4x256xi1>, vector<4x256xf32>
    %c44 = arith.constant 44 : index
    %c0_61 = arith.constant 0 : index
    %119 = vector.load %arg8[%c44, %c0_61] : memref<256x256xf32, #tpu.memory_space<vmem>>, vector<4x256xf32>
    tpu.vector_store %arg8[%c44, %c0_61], %118 {strides = array<i32>} : memref<256x256xf32, #tpu.memory_space<vmem>>, vector<4x256xf32>,
    %c0_62 = arith.constant 0 : index
    %c98 = arith.constant 98 : index
    %120 = vector.load %arg7[%c0_62, %c98] : memref<4x512xf32, #tpu.memory_space<vmem>>, vector<4x256xf32>
    %cst_63 = arith.constant 0.000000e+00 : f32
    %121 = vector.broadcast %cst_63 : f32 to vector<4x256xf32>
    %122 = arith.select %66, %120, %121 : vector<4x256xi1>, vector<4x256xf32>
    %c48 = arith.constant 48 : index
    %c0_64 = arith.constant 0 : index
    %123 = vector.load %arg8[%c48, %c0_64] : memref<256x256xf32, #tpu.memory_space<vmem>>, vector<4x256xf32>
    tpu.vector_store %arg8[%c48, %c0_64], %122 {strides = array<i32>} : memref<256x256xf32, #tpu.memory_space<vmem>>, vector<4x256xf32>,
    %c0_65 = arith.constant 0 : index
    %c99 = arith.constant 99 : index
    %124 = vector.load %arg7[%c0_65, %c99] : memref<4x512xf32, #tpu.memory_space<vmem>>, vector<4x256xf32>
    %cst_66 = arith.constant 0.000000e+00 : f32
    %125 = vector.broadcast %cst_66 : f32 to vector<4x256xf32>
    %126 = arith.select %75, %124, %125 : vector<4x256xi1>, vector<4x256xf32>
    %c52 = arith.constant 52 : index
    %c0_67 = arith.constant 0 : index
    %127 = vector.load %arg8[%c52, %c0_67] : memref<256x256xf32, #tpu.memory_space<vmem>>, vector<4x256xf32>
    tpu.vector_store %arg8[%c52, %c0_67], %126 {strides = array<i32>} : memref<256x256xf32, #tpu.memory_space<vmem>>, vector<4x256xf32>,
    %c0_68 = arith.constant 0 : index
    %c109 = arith.constant 109 : index
    %128 = vector.load %arg7[%c0_68, %c109] : memref<4x512xf32, #tpu.memory_space<vmem>>, vector<4x256xf32>
    %cst_69 = arith.constant 0.000000e+00 : f32
    %129 = vector.broadcast %cst_69 : f32 to vector<4x256xf32>
    %130 = arith.select %30, %128, %129 : vector<4x256xi1>, vector<4x256xf32>
    %c56 = arith.constant 56 : index
    %c0_70 = arith.constant 0 : index
    %131 = vector.load %arg8[%c56, %c0_70] : memref<256x256xf32, #tpu.memory_space<vmem>>, vector<4x256xf32>
    tpu.vector_store %arg8[%c56, %c0_70], %130 {strides = array<i32>} : memref<256x256xf32, #tpu.memory_space<vmem>>, vector<4x256xf32>,
    %c0_71 = arith.constant 0 : index
    %c110 = arith.constant 110 : index
    %132 = vector.load %arg7[%c0_71, %c110] : memref<4x512xf32, #tpu.memory_space<vmem>>, vector<4x256xf32>
    %cst_72 = arith.constant 0.000000e+00 : f32
    %133 = vector.broadcast %cst_72 : f32 to vector<4x256xf32>
    %134 = arith.select %39, %132, %133 : vector<4x256xi1>, vector<4x256xf32>
    %c60 = arith.constant 60 : index
    %c0_73 = arith.constant 0 : index
    %135 = vector.load %arg8[%c60, %c0_73] : memref<256x256xf32, #tpu.memory_space<vmem>>, vector<4x256xf32>
    tpu.vector_store %arg8[%c60, %c0_73], %134 {strides = array<i32>} : memref<256x256xf32, #tpu.memory_space<vmem>>, vector<4x256xf32>,
    %c0_74 = arith.constant 0 : index
    %c111 = arith.constant 111 : index
    %136 = vector.load %arg7[%c0_74, %c111] : memref<4x512xf32, #tpu.memory_space<vmem>>, vector<4x256xf32>
    %cst_75 = arith.constant 0.000000e+00 : f32
    %137 = vector.broadcast %cst_75 : f32 to vector<4x256xf32>
    %138 = arith.select %48, %136, %137 : vector<4x256xi1>, vector<4x256xf32>
    %c64 = arith.constant 64 : index
    %c0_76 = arith.constant 0 : index
    %139 = vector.load %arg8[%c64, %c0_76] : memref<256x256xf32, #tpu.memory_space<vmem>>, vector<4x256xf32>
    tpu.vector_store %arg8[%c64, %c0_76], %138 {strides = array<i32>} : memref<256x256xf32, #tpu.memory_space<vmem>>, vector<4x256xf32>,
    %c0_77 = arith.constant 0 : index
    %c112 = arith.constant 112 : index
    %140 = vector.load %arg7[%c0_77, %c112] : memref<4x512xf32, #tpu.memory_space<vmem>>, vector<4x256xf32>
    %c68 = arith.constant 68 : index
    %c0_78 = arith.constant 0 : index
    %141 = vector.load %arg8[%c68, %c0_78] : memref<256x256xf32, #tpu.memory_space<vmem>>, vector<4x256xf32>
    tpu.vector_store %arg8[%c68, %c0_78], %140 {strides = array<i32>} : memref<256x256xf32, #tpu.memory_space<vmem>>, vector<4x256xf32>,
    %c0_79 = arith.constant 0 : index
    %c113 = arith.constant 113 : index
    %142 = vector.load %arg7[%c0_79, %c113] : memref<4x512xf32, #tpu.memory_space<vmem>>, vector<4x256xf32>
    %cst_80 = arith.constant 0.000000e+00 : f32
    %143 = vector.broadcast %cst_80 : f32 to vector<4x256xf32>
    %144 = arith.select %57, %142, %143 : vector<4x256xi1>, vector<4x256xf32>
    %c72 = arith.constant 72 : index
    %c0_81 = arith.constant 0 : index
    %145 = vector.load %arg8[%c72, %c0_81] : memref<256x256xf32, #tpu.memory_space<vmem>>, vector<4x256xf32>
    tpu.vector_store %arg8[%c72, %c0_81], %144 {strides = array<i32>} : memref<256x256xf32, #tpu.memory_space<vmem>>, vector<4x256xf32>,
    %c0_82 = arith.constant 0 : index
    %c114 = arith.constant 114 : index
    %146 = vector.load %arg7[%c0_82, %c114] : memref<4x512xf32, #tpu.memory_space<vmem>>, vector<4x256xf32>
    %cst_83 = arith.constant 0.000000e+00 : f32
    %147 = vector.broadcast %cst_83 : f32 to vector<4x256xf32>
    %148 = arith.select %66, %146, %147 : vector<4x256xi1>, vector<4x256xf32>
    %c76 = arith.constant 76 : index
    %c0_84 = arith.constant 0 : index
    %149 = vector.load %arg8[%c76, %c0_84] : memref<256x256xf32, #tpu.memory_space<vmem>>, vector<4x256xf32>
    tpu.vector_store %arg8[%c76, %c0_84], %148 {strides = array<i32>} : memref<256x256xf32, #tpu.memory_space<vmem>>, vector<4x256xf32>,
    %c0_85 = arith.constant 0 : index
    %c115 = arith.constant 115 : index
    %150 = vector.load %arg7[%c0_85, %c115] : memref<4x512xf32, #tpu.memory_space<vmem>>, vector<4x256xf32>
    %cst_86 = arith.constant 0.000000e+00 : f32
    %151 = vector.broadcast %cst_86 : f32 to vector<4x256xf32>
    %152 = arith.select %75, %150, %151 : vector<4x256xi1>, vector<4x256xf32>
    %c80_87 = arith.constant 80 : index
    %c0_88 = arith.constant 0 : index
    %153 = vector.load %arg8[%c80_87, %c0_88] : memref<256x256xf32, #tpu.memory_space<vmem>>, vector<4x256xf32>
    tpu.vector_store %arg8[%c80_87, %c0_88], %152 {strides = array<i32>} : memref<256x256xf32, #tpu.memory_space<vmem>>, vector<4x256xf32>,
    %c0_89 = arith.constant 0 : index
    %c125 = arith.constant 125 : index
    %154 = vector.load %arg7[%c0_89, %c125] : memref<4x512xf32, #tpu.memory_space<vmem>>, vector<4x256xf32>
    %cst_90 = arith.constant 0.000000e+00 : f32
    %155 = vector.broadcast %cst_90 : f32 to vector<4x256xf32>
    %156 = arith.select %30, %154, %155 : vector<4x256xi1>, vector<4x256xf32>
    %c84 = arith.constant 84 : index
    %c0_91 = arith.constant 0 : index
    %157 = vector.load %arg8[%c84, %c0_91] : memref<256x256xf32, #tpu.memory_space<vmem>>, vector<4x256xf32>
    tpu.vector_store %arg8[%c84, %c0_91], %156 {strides = array<i32>} : memref<256x256xf32, #tpu.memory_space<vmem>>, vector<4x256xf32>,
    %c0_92 = arith.constant 0 : index
    %c126 = arith.constant 126 : index
    %158 = vector.load %arg7[%c0_92, %c126] : memref<4x512xf32, #tpu.memory_space<vmem>>, vector<4x256xf32>
    %cst_93 = arith.constant 0.000000e+00 : f32
    %159 = vector.broadcast %cst_93 : f32 to vector<4x256xf32>
    %160 = arith.select %39, %158, %159 : vector<4x256xi1>, vector<4x256xf32>
    %c88 = arith.constant 88 : index
    %c0_94 = arith.constant 0 : index
    %161 = vector.load %arg8[%c88, %c0_94] : memref<256x256xf32, #tpu.memory_space<vmem>>, vector<4x256xf32>
    tpu.vector_store %arg8[%c88, %c0_94], %160 {strides = array<i32>} : memref<256x256xf32, #tpu.memory_space<vmem>>, vector<4x256xf32>,
    %c0_95 = arith.constant 0 : index
    %c127 = arith.constant 127 : index
    %162 = vector.load %arg7[%c0_95, %c127] : memref<4x512xf32, #tpu.memory_space<vmem>>, vector<4x256xf32>
    %cst_96 = arith.constant 0.000000e+00 : f32
    %163 = vector.broadcast %cst_96 : f32 to vector<4x256xf32>
    %164 = arith.select %48, %162, %163 : vector<4x256xi1>, vector<4x256xf32>
    %c92 = arith.constant 92 : index
    %c0_97 = arith.constant 0 : index
    %165 = vector.load %arg8[%c92, %c0_97] : memref<256x256xf32, #tpu.memory_space<vmem>>, vector<4x256xf32>
    tpu.vector_store %arg8[%c92, %c0_97], %164 {strides = array<i32>} : memref<256x256xf32, #tpu.memory_space<vmem>>, vector<4x256xf32>,
    %c0_98 = arith.constant 0 : index
    %c128_99 = arith.constant 128 : index
    %166 = vector.load %arg7[%c0_98, %c128_99] : memref<4x512xf32, #tpu.memory_space<vmem>>, vector<4x256xf32>
    %c96_100 = arith.constant 96 : index
    %c0_101 = arith.constant 0 : index
    %167 = vector.load %arg8[%c96_100, %c0_101] : memref<256x256xf32, #tpu.memory_space<vmem>>, vector<4x256xf32>
    tpu.vector_store %arg8[%c96_100, %c0_101], %166 {strides = array<i32>} : memref<256x256xf32, #tpu.memory_space<vmem>>, vector<4x256xf32>,
    %c0_102 = arith.constant 0 : index
    %c129 = arith.constant 129 : index
    %168 = vector.load %arg7[%c0_102, %c129] : memref<4x512xf32, #tpu.memory_space<vmem>>, vector<4x256xf32>
    %cst_103 = arith.constant 0.000000e+00 : f32
    %169 = vector.broadcast %cst_103 : f32 to vector<4x256xf32>
    %170 = arith.select %57, %168, %169 : vector<4x256xi1>, vector<4x256xf32>
    %c100 = arith.constant 100 : index
    %c0_104 = arith.constant 0 : index
    %171 = vector.load %arg8[%c100, %c0_104] : memref<256x256xf32, #tpu.memory_space<vmem>>, vector<4x256xf32>
    tpu.vector_store %arg8[%c100, %c0_104], %170 {strides = array<i32>} : memref<256x256xf32, #tpu.memory_space<vmem>>, vector<4x256xf32>,
    %c0_105 = arith.constant 0 : index
    %c130 = arith.constant 130 : index
    %172 = vector.load %arg7[%c0_105, %c130] : memref<4x512xf32, #tpu.memory_space<vmem>>, vector<4x256xf32>
    %cst_106 = arith.constant 0.000000e+00 : f32
    %173 = vector.broadcast %cst_106 : f32 to vector<4x256xf32>
    %174 = arith.select %66, %172, %173 : vector<4x256xi1>, vector<4x256xf32>
    %c104 = arith.constant 104 : index
    %c0_107 = arith.constant 0 : index
    %175 = vector.load %arg8[%c104, %c0_107] : memref<256x256xf32, #tpu.memory_space<vmem>>, vector<4x256xf32>
    tpu.vector_store %arg8[%c104, %c0_107], %174 {strides = array<i32>} : memref<256x256xf32, #tpu.memory_space<vmem>>, vector<4x256xf32>,
    %c0_108 = arith.constant 0 : index
    %c131 = arith.constant 131 : index
    %176 = vector.load %arg7[%c0_108, %c131] : memref<4x512xf32, #tpu.memory_space<vmem>>, vector<4x256xf32>
    %cst_109 = arith.constant 0.000000e+00 : f32
    %177 = vector.broadcast %cst_109 : f32 to vector<4x256xf32>
    %178 = arith.select %75, %176, %177 : vector<4x256xi1>, vector<4x256xf32>
    %c108 = arith.constant 108 : index
    %c0_110 = arith.constant 0 : index
    %179 = vector.load %arg8[%c108, %c0_110] : memref<256x256xf32, #tpu.memory_space<vmem>>, vector<4x256xf32>
    tpu.vector_store %arg8[%c108, %c0_110], %178 {strides = array<i32>} : memref<256x256xf32, #tpu.memory_space<vmem>>, vector<4x256xf32>,
    %c0_111 = arith.constant 0 : index
    %c141 = arith.constant 141 : index
    %180 = vector.load %arg7[%c0_111, %c141] : memref<4x512xf32, #tpu.memory_space<vmem>>, vector<4x256xf32>
    %cst_112 = arith.constant 0.000000e+00 : f32
    %181 = vector.broadcast %cst_112 : f32 to vector<4x256xf32>
    %182 = arith.select %30, %180, %181 : vector<4x256xi1>, vector<4x256xf32>
    %c112_113 = arith.constant 112 : index
    %c0_114 = arith.constant 0 : index
    %183 = vector.load %arg8[%c112_113, %c0_114] : memref<256x256xf32, #tpu.memory_space<vmem>>, vector<4x256xf32>
    tpu.vector_store %arg8[%c112_113, %c0_114], %182 {strides = array<i32>} : memref<256x256xf32, #tpu.memory_space<vmem>>, vector<4x256xf32>,
    %c0_115 = arith.constant 0 : index
    %c142 = arith.constant 142 : index
    %184 = vector.load %arg7[%c0_115, %c142] : memref<4x512xf32, #tpu.memory_space<vmem>>, vector<4x256xf32>
    %cst_116 = arith.constant 0.000000e+00 : f32
    %185 = vector.broadcast %cst_116 : f32 to vector<4x256xf32>
    %186 = arith.select %39, %184, %185 : vector<4x256xi1>, vector<4x256xf32>
    %c116 = arith.constant 116 : index
    %c0_117 = arith.constant 0 : index
    %187 = vector.load %arg8[%c116, %c0_117] : memref<256x256xf32, #tpu.memory_space<vmem>>, vector<4x256xf32>
    tpu.vector_store %arg8[%c116, %c0_117], %186 {strides = array<i32>} : memref<256x256xf32, #tpu.memory_space<vmem>>, vector<4x256xf32>,
    %c0_118 = arith.constant 0 : index
    %c143 = arith.constant 143 : index
    %188 = vector.load %arg7[%c0_118, %c143] : memref<4x512xf32, #tpu.memory_space<vmem>>, vector<4x256xf32>
    %cst_119 = arith.constant 0.000000e+00 : f32
    %189 = vector.broadcast %cst_119 : f32 to vector<4x256xf32>
    %190 = arith.select %48, %188, %189 : vector<4x256xi1>, vector<4x256xf32>
    %c120 = arith.constant 120 : index
    %c0_120 = arith.constant 0 : index
    %191 = vector.load %arg8[%c120, %c0_120] : memref<256x256xf32, #tpu.memory_space<vmem>>, vector<4x256xf32>
    tpu.vector_store %arg8[%c120, %c0_120], %190 {strides = array<i32>} : memref<256x256xf32, #tpu.memory_space<vmem>>, vector<4x256xf32>,
    %c0_121 = arith.constant 0 : index
    %c144 = arith.constant 144 : index
    %192 = vector.load %arg7[%c0_121, %c144] : memref<4x512xf32, #tpu.memory_space<vmem>>, vector<4x256xf32>
    %c124 = arith.constant 124 : index
    %c0_122 = arith.constant 0 : index
    %193 = vector.load %arg8[%c124, %c0_122] : memref<256x256xf32, #tpu.memory_space<vmem>>, vector<4x256xf32>
    tpu.vector_store %arg8[%c124, %c0_122], %192 {strides = array<i32>} : memref<256x256xf32, #tpu.memory_space<vmem>>, vector<4x256xf32>,
    %c0_123 = arith.constant 0 : index
    %c145 = arith.constant 145 : index
    %194 = vector.load %arg7[%c0_123, %c145] : memref<4x512xf32, #tpu.memory_space<vmem>>, vector<4x256xf32>
    %cst_124 = arith.constant 0.000000e+00 : f32
    %195 = vector.broadcast %cst_124 : f32 to vector<4x256xf32>
    %196 = arith.select %57, %194, %195 : vector<4x256xi1>, vector<4x256xf32>
    %c128_125 = arith.constant 128 : index
    %c0_126 = arith.constant 0 : index
    %197 = vector.load %arg8[%c128_125, %c0_126] : memref<256x256xf32, #tpu.memory_space<vmem>>, vector<4x256xf32>
    tpu.vector_store %arg8[%c128_125, %c0_126], %196 {strides = array<i32>} : memref<256x256xf32, #tpu.memory_space<vmem>>, vector<4x256xf32>,
    %c0_127 = arith.constant 0 : index
    %c146 = arith.constant 146 : index
    %198 = vector.load %arg7[%c0_127, %c146] : memref<4x512xf32, #tpu.memory_space<vmem>>, vector<4x256xf32>
    %cst_128 = arith.constant 0.000000e+00 : f32
    %199 = vector.broadcast %cst_128 : f32 to vector<4x256xf32>
    %200 = arith.select %66, %198, %199 : vector<4x256xi1>, vector<4x256xf32>
    %c132 = arith.constant 132 : index
    %c0_129 = arith.constant 0 : index
    %201 = vector.load %arg8[%c132, %c0_129] : memref<256x256xf32, #tpu.memory_space<vmem>>, vector<4x256xf32>
    tpu.vector_store %arg8[%c132, %c0_129], %200 {strides = array<i32>} : memref<256x256xf32, #tpu.memory_space<vmem>>, vector<4x256xf32>,
    %c0_130 = arith.constant 0 : index
    %c147 = arith.constant 147 : index
    %202 = vector.load %arg7[%c0_130, %c147] : memref<4x512xf32, #tpu.memory_space<vmem>>, vector<4x256xf32>
    %cst_131 = arith.constant 0.000000e+00 : f32
    %203 = vector.broadcast %cst_131 : f32 to vector<4x256xf32>
    %204 = arith.select %75, %202, %203 : vector<4x256xi1>, vector<4x256xf32>
    %c136 = arith.constant 136 : index
    %c0_132 = arith.constant 0 : index
    %205 = vector.load %arg8[%c136, %c0_132] : memref<256x256xf32, #tpu.memory_space<vmem>>, vector<4x256xf32>
    tpu.vector_store %arg8[%c136, %c0_132], %204 {strides = array<i32>} : memref<256x256xf32, #tpu.memory_space<vmem>>, vector<4x256xf32>,
    %c0_133 = arith.constant 0 : index
    %c157 = arith.constant 157 : index
    %206 = vector.load %arg7[%c0_133, %c157] : memref<4x512xf32, #tpu.memory_space<vmem>>, vector<4x256xf32>
    %cst_134 = arith.constant 0.000000e+00 : f32
    %207 = vector.broadcast %cst_134 : f32 to vector<4x256xf32>
    %208 = arith.select %30, %206, %207 : vector<4x256xi1>, vector<4x256xf32>
    %c140 = arith.constant 140 : index
    %c0_135 = arith.constant 0 : index
    %209 = vector.load %arg8[%c140, %c0_135] : memref<256x256xf32, #tpu.memory_space<vmem>>, vector<4x256xf32>
    tpu.vector_store %arg8[%c140, %c0_135], %208 {strides = array<i32>} : memref<256x256xf32, #tpu.memory_space<vmem>>, vector<4x256xf32>,
    %c0_136 = arith.constant 0 : index
    %c158 = arith.constant 158 : index
    %210 = vector.load %arg7[%c0_136, %c158] : memref<4x512xf32, #tpu.memory_space<vmem>>, vector<4x256xf32>
    %cst_137 = arith.constant 0.000000e+00 : f32
    %211 = vector.broadcast %cst_137 : f32 to vector<4x256xf32>
    %212 = arith.select %39, %210, %211 : vector<4x256xi1>, vector<4x256xf32>
    %c144_138 = arith.constant 144 : index
    %c0_139 = arith.constant 0 : index
    %213 = vector.load %arg8[%c144_138, %c0_139] : memref<256x256xf32, #tpu.memory_space<vmem>>, vector<4x256xf32>
    tpu.vector_store %arg8[%c144_138, %c0_139], %212 {strides = array<i32>} : memref<256x256xf32, #tpu.memory_space<vmem>>, vector<4x256xf32>,
    %c0_140 = arith.constant 0 : index
    %c159 = arith.constant 159 : index
    %214 = vector.load %arg7[%c0_140, %c159] : memref<4x512xf32, #tpu.memory_space<vmem>>, vector<4x256xf32>
    %cst_141 = arith.constant 0.000000e+00 : f32
    %215 = vector.broadcast %cst_141 : f32 to vector<4x256xf32>
    %216 = arith.select %48, %214, %215 : vector<4x256xi1>, vector<4x256xf32>
    %c148 = arith.constant 148 : index
    %c0_142 = arith.constant 0 : index
    %217 = vector.load %arg8[%c148, %c0_142] : memref<256x256xf32, #tpu.memory_space<vmem>>, vector<4x256xf32>
    tpu.vector_store %arg8[%c148, %c0_142], %216 {strides = array<i32>} : memref<256x256xf32, #tpu.memory_space<vmem>>, vector<4x256xf32>,
    %c0_143 = arith.constant 0 : index
    %c160 = arith.constant 160 : index
    %218 = vector.load %arg7[%c0_143, %c160] : memref<4x512xf32, #tpu.memory_space<vmem>>, vector<4x256xf32>
    %c152 = arith.constant 152 : index
    %c0_144 = arith.constant 0 : index
    %219 = vector.load %arg8[%c152, %c0_144] : memref<256x256xf32, #tpu.memory_space<vmem>>, vector<4x256xf32>
    tpu.vector_store %arg8[%c152, %c0_144], %218 {strides = array<i32>} : memref<256x256xf32, #tpu.memory_space<vmem>>, vector<4x256xf32>,
    %c0_145 = arith.constant 0 : index
    %c161 = arith.constant 161 : index
    %220 = vector.load %arg7[%c0_145, %c161] : memref<4x512xf32, #tpu.memory_space<vmem>>, vector<4x256xf32>
    %cst_146 = arith.constant 0.000000e+00 : f32
    %221 = vector.broadcast %cst_146 : f32 to vector<4x256xf32>
    %222 = arith.select %57, %220, %221 : vector<4x256xi1>, vector<4x256xf32>
    %c156 = arith.constant 156 : index
    %c0_147 = arith.constant 0 : index
    %223 = vector.load %arg8[%c156, %c0_147] : memref<256x256xf32, #tpu.memory_space<vmem>>, vector<4x256xf32>
    tpu.vector_store %arg8[%c156, %c0_147], %222 {strides = array<i32>} : memref<256x256xf32, #tpu.memory_space<vmem>>, vector<4x256xf32>,
    %c0_148 = arith.constant 0 : index
    %c162 = arith.constant 162 : index
    %224 = vector.load %arg7[%c0_148, %c162] : memref<4x512xf32, #tpu.memory_space<vmem>>, vector<4x256xf32>
    %cst_149 = arith.constant 0.000000e+00 : f32
    %225 = vector.broadcast %cst_149 : f32 to vector<4x256xf32>
    %226 = arith.select %66, %224, %225 : vector<4x256xi1>, vector<4x256xf32>
    %c160_150 = arith.constant 160 : index
    %c0_151 = arith.constant 0 : index
    %227 = vector.load %arg8[%c160_150, %c0_151] : memref<256x256xf32, #tpu.memory_space<vmem>>, vector<4x256xf32>
    tpu.vector_store %arg8[%c160_150, %c0_151], %226 {strides = array<i32>} : memref<256x256xf32, #tpu.memory_space<vmem>>, vector<4x256xf32>,
    %c0_152 = arith.constant 0 : index
    %c163 = arith.constant 163 : index
    %228 = vector.load %arg7[%c0_152, %c163] : memref<4x512xf32, #tpu.memory_space<vmem>>, vector<4x256xf32>
    %cst_153 = arith.constant 0.000000e+00 : f32
    %229 = vector.broadcast %cst_153 : f32 to vector<4x256xf32>
    %230 = arith.select %75, %228, %229 : vector<4x256xi1>, vector<4x256xf32>
    %c164 = arith.constant 164 : index
    %c0_154 = arith.constant 0 : index
    %231 = vector.load %arg8[%c164, %c0_154] : memref<256x256xf32, #tpu.memory_space<vmem>>, vector<4x256xf32>
    tpu.vector_store %arg8[%c164, %c0_154], %230 {strides = array<i32>} : memref<256x256xf32, #tpu.memory_space<vmem>>, vector<4x256xf32>,
    %c0_155 = arith.constant 0 : index
    %c173 = arith.constant 173 : index
    %232 = vector.load %arg7[%c0_155, %c173] : memref<4x512xf32, #tpu.memory_space<vmem>>, vector<4x256xf32>
    %cst_156 = arith.constant 0.000000e+00 : f32
    %233 = vector.broadcast %cst_156 : f32 to vector<4x256xf32>
    %234 = arith.select %30, %232, %233 : vector<4x256xi1>, vector<4x256xf32>
    %c168 = arith.constant 168 : index
    %c0_157 = arith.constant 0 : index
    %235 = vector.load %arg8[%c168, %c0_157] : memref<256x256xf32, #tpu.memory_space<vmem>>, vector<4x256xf32>
    tpu.vector_store %arg8[%c168, %c0_157], %234 {strides = array<i32>} : memref<256x256xf32, #tpu.memory_space<vmem>>, vector<4x256xf32>,
    %c0_158 = arith.constant 0 : index
    %c174 = arith.constant 174 : index
    %236 = vector.load %arg7[%c0_158, %c174] : memref<4x512xf32, #tpu.memory_space<vmem>>, vector<4x256xf32>
    %cst_159 = arith.constant 0.000000e+00 : f32
    %237 = vector.broadcast %cst_159 : f32 to vector<4x256xf32>
    %238 = arith.select %39, %236, %237 : vector<4x256xi1>, vector<4x256xf32>
    %c172 = arith.constant 172 : index
    %c0_160 = arith.constant 0 : index
    %239 = vector.load %arg8[%c172, %c0_160] : memref<256x256xf32, #tpu.memory_space<vmem>>, vector<4x256xf32>
    tpu.vector_store %arg8[%c172, %c0_160], %238 {strides = array<i32>} : memref<256x256xf32, #tpu.memory_space<vmem>>, vector<4x256xf32>,
    %c0_161 = arith.constant 0 : index
    %c175 = arith.constant 175 : index
    %240 = vector.load %arg7[%c0_161, %c175] : memref<4x512xf32, #tpu.memory_space<vmem>>, vector<4x256xf32>
    %cst_162 = arith.constant 0.000000e+00 : f32
    %241 = vector.broadcast %cst_162 : f32 to vector<4x256xf32>
    %242 = arith.select %48, %240, %241 : vector<4x256xi1>, vector<4x256xf32>
    %c176 = arith.constant 176 : index
    %c0_163 = arith.constant 0 : index
    %243 = vector.load %arg8[%c176, %c0_163] : memref<256x256xf32, #tpu.memory_space<vmem>>, vector<4x256xf32>
    tpu.vector_store %arg8[%c176, %c0_163], %242 {strides = array<i32>} : memref<256x256xf32, #tpu.memory_space<vmem>>, vector<4x256xf32>,
    %c0_164 = arith.constant 0 : index
    %c176_165 = arith.constant 176 : index
    %244 = vector.load %arg7[%c0_164, %c176_165] : memref<4x512xf32, #tpu.memory_space<vmem>>, vector<4x256xf32>
    %c180 = arith.constant 180 : index
    %c0_166 = arith.constant 0 : index
    %245 = vector.load %arg8[%c180, %c0_166] : memref<256x256xf32, #tpu.memory_space<vmem>>, vector<4x256xf32>
    tpu.vector_store %arg8[%c180, %c0_166], %244 {strides = array<i32>} : memref<256x256xf32, #tpu.memory_space<vmem>>, vector<4x256xf32>,
    %c0_167 = arith.constant 0 : index
    %c177 = arith.constant 177 : index
    %246 = vector.load %arg7[%c0_167, %c177] : memref<4x512xf32, #tpu.memory_space<vmem>>, vector<4x256xf32>
    %cst_168 = arith.constant 0.000000e+00 : f32
    %247 = vector.broadcast %cst_168 : f32 to vector<4x256xf32>
    %248 = arith.select %57, %246, %247 : vector<4x256xi1>, vector<4x256xf32>
    %c184 = arith.constant 184 : index
    %c0_169 = arith.constant 0 : index
    %249 = vector.load %arg8[%c184, %c0_169] : memref<256x256xf32, #tpu.memory_space<vmem>>, vector<4x256xf32>
    tpu.vector_store %arg8[%c184, %c0_169], %248 {strides = array<i32>} : memref<256x256xf32, #tpu.memory_space<vmem>>, vector<4x256xf32>,
    %c0_170 = arith.constant 0 : index
    %c178 = arith.constant 178 : index
    %250 = vector.load %arg7[%c0_170, %c178] : memref<4x512xf32, #tpu.memory_space<vmem>>, vector<4x256xf32>
    %cst_171 = arith.constant 0.000000e+00 : f32
    %251 = vector.broadcast %cst_171 : f32 to vector<4x256xf32>
    %252 = arith.select %66, %250, %251 : vector<4x256xi1>, vector<4x256xf32>
    %c188 = arith.constant 188 : index
    %c0_172 = arith.constant 0 : index
    %253 = vector.load %arg8[%c188, %c0_172] : memref<256x256xf32, #tpu.memory_space<vmem>>, vector<4x256xf32>
    tpu.vector_store %arg8[%c188, %c0_172], %252 {strides = array<i32>} : memref<256x256xf32, #tpu.memory_space<vmem>>, vector<4x256xf32>,
    %c0_173 = arith.constant 0 : index
    %c179 = arith.constant 179 : index
    %254 = vector.load %arg7[%c0_173, %c179] : memref<4x512xf32, #tpu.memory_space<vmem>>, vector<4x256xf32>
    %cst_174 = arith.constant 0.000000e+00 : f32
    %255 = vector.broadcast %cst_174 : f32 to vector<4x256xf32>
    %256 = arith.select %75, %254, %255 : vector<4x256xi1>, vector<4x256xf32>
    %c192 = arith.constant 192 : index
    %c0_175 = arith.constant 0 : index
    %257 = vector.load %arg8[%c192, %c0_175] : memref<256x256xf32, #tpu.memory_space<vmem>>, vector<4x256xf32>
    tpu.vector_store %arg8[%c192, %c0_175], %256 {strides = array<i32>} : memref<256x256xf32, #tpu.memory_space<vmem>>, vector<4x256xf32>,
    %cst_176 = arith.constant 0.000000e+00 : f32
    %258 = vector.broadcast %cst_176 : f32 to vector<60x256xf32>
    %c196 = arith.constant 196 : index
    %c0_177 = arith.constant 0 : index
    %259 = vector.load %arg8[%c196, %c0_177] : memref<256x256xf32, #tpu.memory_space<vmem>>, vector<60x256xf32>
    tpu.vector_store %arg8[%c196, %c0_177], %258 {strides = array<i32>} : memref<256x256xf32, #tpu.memory_space<vmem>>, vector<60x256xf32>,
    %c0_178 = arith.constant 0 : index
    %c0_179 = arith.constant 0 : index
    %260 = vector.load %arg2[%c0_178, %c0_179] : memref<16x256xf32, #tpu.memory_space<vmem>>, vector<16x256xf32>
    %c0_180 = arith.constant 0 : index
    %c0_181 = arith.constant 0 : index
    %261 = vector.load %arg8[%c0_180, %c0_181] : memref<256x256xf32, #tpu.memory_space<vmem>>, vector<256x256xf32>
    %cst_182 = arith.constant dense<0.000000e+00> : vector<16x256xf32>
    %262 = tpu.matmul %260, %261, %cst_182 {dimension_numbers = #tpu.dot_dimension_numbers<[1], [0], [0], [1], [0, 0, 1, 1], [], []>} : vector<16x256xf32>, vector<256x256xf32>, vector<16x256xf32> -> vector<16x256xf32>
    %c0_183 = arith.constant 0 : index
    %c0_184 = arith.constant 0 : index
    %263 = vector.load %arg3[%c0_183, %c0_184] : memref<16x1xf32, #tpu.memory_space<vmem>>, vector<16x1xf32>
    %264 = vector.broadcast %263 : vector<16x1xf32> to vector<16x256xf32>
    %265 = arith.addf %262, %264 : vector<16x256xf32>
    %cst_185 = arith.constant 0.000000e+00 : f32
    %266 = vector.broadcast %cst_185 : f32 to vector<16x256xf32>
    %267 = arith.maximumf %265, %266 : vector<16x256xf32>
    %268 = vector.extract_strided_slice %267 {offsets = [0, 0], sizes = [4, 256], strides = [1, 1]} : vector<16x256xf32> to vector<4x256xf32>
    %269 = vector.extract_strided_slice %267 {offsets = [4, 0], sizes = [4, 256], strides = [1, 1]} : vector<16x256xf32> to vector<4x256xf32>
    %270 = arith.addf %268, %269 : vector<4x256xf32>
    %271 = vector.extract_strided_slice %267 {offsets = [8, 0], sizes = [4, 256], strides = [1, 1]} : vector<16x256xf32> to vector<4x256xf32>
    %272 = arith.addf %270, %271 : vector<4x256xf32>
    %273 = vector.extract_strided_slice %267 {offsets = [12, 0], sizes = [4, 256], strides = [1, 1]} : vector<16x256xf32> to vector<4x256xf32>
    %274 = arith.addf %272, %273 : vector<4x256xf32>
    %cst_186 = arith.constant dense<0.000000e+00> : vector<4xf32>
    %275 = vector.multi_reduction <add>, %274, %cst_186 [1] : vector<4x256xf32> to vector<4xf32>
    %276 = vector.shape_cast %275 : vector<4xf32> to vector<4x1xf32>
    %c0_187 = arith.constant 0 : index
    %c0_188 = arith.constant 0 : index
    %277 = vector.load %arg4[%c0_187, %c0_188] : memref<16x4xf32, #tpu.memory_space<vmem>>, vector<16x4xf32>
    %cst_189 = arith.constant dense<0.000000e+00> : vector<16x1xf32>
    %278 = tpu.matmul %277, %276, %cst_189 {dimension_numbers = #tpu.dot_dimension_numbers<[1], [0], [0], [1], [0, 0, 1, 1], [], []>} : vector<16x4xf32>, vector<4x1xf32>, vector<16x1xf32> -> vector<16x1xf32>
    %c0_190 = arith.constant 0 : index
    %c0_191 = arith.constant 0 : index
    %279 = vector.load %arg5[%c0_190, %c0_191] : memref<16x1xf32, #tpu.memory_space<vmem>>, vector<16x1xf32>
    %280 = arith.addf %278, %279 : vector<16x1xf32>
    %281 = vector.extract_strided_slice %280 {offsets = [0, 0], sizes = [4, 1], strides = [1, 1]} : vector<16x1xf32> to vector<4x1xf32>
    %282 = vector.extract_strided_slice %280 {offsets = [4, 0], sizes = [4, 1], strides = [1, 1]} : vector<16x1xf32> to vector<4x1xf32>
    %283 = arith.maximumf %281, %282 : vector<4x1xf32>
    %284 = vector.extract_strided_slice %280 {offsets = [8, 0], sizes = [4, 1], strides = [1, 1]} : vector<16x1xf32> to vector<4x1xf32>
    %285 = arith.maximumf %283, %284 : vector<4x1xf32>
    %286 = vector.extract_strided_slice %280 {offsets = [12, 0], sizes = [4, 1], strides = [1, 1]} : vector<16x1xf32> to vector<4x1xf32>
    %287 = arith.maximumf %285, %286 : vector<4x1xf32>
    %288 = vector.extract_strided_slice %280 {offsets = [0, 0], sizes = [4, 1], strides = [1, 1]} : vector<16x1xf32> to vector<4x1xf32>
    %289 = arith.subf %288, %287 : vector<4x1xf32>
    %290 = math.exp %289 : vector<4x1xf32>
    %291 = vector.extract_strided_slice %280 {offsets = [4, 0], sizes = [4, 1], strides = [1, 1]} : vector<16x1xf32> to vector<4x1xf32>
    %292 = arith.subf %291, %287 : vector<4x1xf32>
    %293 = math.exp %292 : vector<4x1xf32>
    %294 = vector.extract_strided_slice %280 {offsets = [8, 0], sizes = [4, 1], strides = [1, 1]} : vector<16x1xf32> to vector<4x1xf32>
    %295 = arith.subf %294, %287 : vector<4x1xf32>
    %296 = math.exp %295 : vector<4x1xf32>
    %297 = vector.extract_strided_slice %280 {offsets = [12, 0], sizes = [4, 1], strides = [1, 1]} : vector<16x1xf32> to vector<4x1xf32>
    %298 = arith.subf %297, %287 : vector<4x1xf32>
    %299 = math.exp %298 : vector<4x1xf32>
    %300 = arith.addf %290, %293 : vector<4x1xf32>
    %301 = arith.addf %300, %296 : vector<4x1xf32>
    %302 = arith.addf %301, %299 : vector<4x1xf32>
    %cst_192 = arith.constant 1.000000e+00 : f32
    %303 = vector.broadcast %cst_192 : f32 to vector<4x1xf32>
    %304 = arith.divf %303, %302 : vector<4x1xf32>
    %305 = arith.mulf %290, %304 : vector<4x1xf32>
    %306 = vector.extract_strided_slice %267 {offsets = [0, 0], sizes = [4, 256], strides = [1, 1]} : vector<16x256xf32> to vector<4x256xf32>
    %307 = vector.broadcast %305 : vector<4x1xf32> to vector<4x256xf32>
    %308 = arith.mulf %307, %306 : vector<4x256xf32>
    %309 = arith.mulf %293, %304 : vector<4x1xf32>
    %310 = vector.extract_strided_slice %267 {offsets = [4, 0], sizes = [4, 256], strides = [1, 1]} : vector<16x256xf32> to vector<4x256xf32>
    %311 = vector.broadcast %309 : vector<4x1xf32> to vector<4x256xf32>
    %312 = arith.mulf %311, %310 : vector<4x256xf32>
    %313 = arith.addf %308, %312 : vector<4x256xf32>
    %314 = arith.mulf %296, %304 : vector<4x1xf32>
    %315 = vector.extract_strided_slice %267 {offsets = [8, 0], sizes = [4, 256], strides = [1, 1]} : vector<16x256xf32> to vector<4x256xf32>
    %316 = vector.broadcast %314 : vector<4x1xf32> to vector<4x256xf32>
    %317 = arith.mulf %316, %315 : vector<4x256xf32>
    %318 = arith.addf %313, %317 : vector<4x256xf32>
    %319 = arith.mulf %299, %304 : vector<4x1xf32>
    %320 = vector.extract_strided_slice %267 {offsets = [12, 0], sizes = [4, 256], strides = [1, 1]} : vector<16x256xf32> to vector<4x256xf32>
    %321 = vector.broadcast %319 : vector<4x1xf32> to vector<4x256xf32>
    %322 = arith.mulf %321, %320 : vector<4x256xf32>
    %323 = arith.addf %318, %322 : vector<4x256xf32>
    %c0_193 = arith.constant 0 : index
    %c0_194 = arith.constant 0 : index
    %c0_195 = arith.constant 0 : index
    %324 = vector.load %arg6[%c0_193, %c0_194, %c0_195] : memref<1x4x256xf32, #tpu.memory_space<vmem>>, vector<1x4x256xf32>
    %325 = vector.shape_cast %324 : vector<1x4x256xf32> to vector<4x256xf32>
    %326 = vector.shape_cast %323 : vector<4x256xf32> to vector<1x4x256xf32>
    tpu.vector_store %arg6[%c0_193, %c0_194, %c0_195], %326 {strides = array<i32>} : memref<1x4x256xf32, #tpu.memory_space<vmem>>, vector<1x4x256xf32>,
    return
  }
  func.func @transform_0(%arg0: i32) -> (i32, i32, i32) {
    %c0_i32 = arith.constant 0 : i32
    %c0_i32_0 = arith.constant 0 : i32
    %c0_i32_1 = arith.constant 0 : i32
    return %arg0, %c0_i32, %c0_i32_0 : i32, i32, i32
  }
  func.func @transform_1(%arg0: i32) -> (i32, i32) {
    %c0_i32 = arith.constant 0 : i32
    %c0_i32_0 = arith.constant 0 : i32
    %c0_i32_1 = arith.constant 0 : i32
    return %c0_i32, %c0_i32_0 : i32, i32
  }
  func.func @transform_2(%arg0: i32) -> (i32, i32) {
    %c0_i32 = arith.constant 0 : i32
    %c0_i32_0 = arith.constant 0 : i32
    %c0_i32_1 = arith.constant 0 : i32
    return %c0_i32, %c0_i32_0 : i32, i32
  }
  func.func @transform_3(%arg0: i32) -> (i32, i32) {
    %c0_i32 = arith.constant 0 : i32
    %c0_i32_0 = arith.constant 0 : i32
    %c0_i32_1 = arith.constant 0 : i32
    return %c0_i32, %c0_i32_0 : i32, i32
  }
  func.func @transform_4(%arg0: i32) -> (i32, i32) {
    %c0_i32 = arith.constant 0 : i32
    %c0_i32_0 = arith.constant 0 : i32
    %c0_i32_1 = arith.constant 0 : i32
    return %c0_i32, %c0_i32_0 : i32, i32
  }
  func.func @transform_5(%arg0: i32) -> (i32, i32, i32) {
    %c0_i32 = arith.constant 0 : i32
    %c0_i32_0 = arith.constant 0 : i32
    %c0_i32_1 = arith.constant 0 : i32
    return %arg0, %c0_i32, %c0_i32_0 : i32, i32, i32
  }
}

</mosaic_0001>

<bundles_post_ra>
// kernel: tpu_custom_call.1
= control target key start
LH: loop header
LB: loop body
LE: loop exit
PB: predicated region body
PF: predicated region fallthrough
CT: control target
= control target key end

     0   :  { %10 = vsyncpa [#allocation5], 0  ;;  %s2701_s0 = inlined_call_operand.vmem [shape: f32[2,4,256], index: 0, kind: input, shape index: {}]   ;;  %s2702_s1 = inlined_call_operand.vmem [shape: f32[16,256], index: 1, kind: input, shape index: {}]   ;;  %s2703_s2 = inlined_call_operand.vmem [shape: f32[16,1], index: 2, kind: input, shape index: {}]   ;;  %s2704_s3 = inlined_call_operand.vmem [shape: f32[16,4], index: 3, kind: input, shape index: {}]   ;;  %s2705_s4 = inlined_call_operand.vmem [shape: f32[16,1], index: 4, kind: input, shape index: {}]   ;;  %s2706_s5 = inlined_call_operand.hbm [shape: f32[2,4,256], index: 5, kind: output, shape index: {}]  }
   0x1   :  { %12 = vsyncpa [#allocation5 + $0x1], 0  ;;  %s2116_s18 = smov 0   ;;  %s2118_s19 = smov 0  }
   0x2   :  { %s2120_s20 = smov 0   ;;  %s2122_s21 = smov 0  }
   0x3 LB: > { %s2137_s22 = sadd.s32 4294967295, %s2033_s21   ;;  %s1837_s23 = sadd.s32 4294967294, %s2033_s21   ;;  %s2033_s21 = sphi %s2122_s21, %s2712_s21   ;;  %s2029_s20 = sphi %s2120_s20, %s2711_s20   ;;  %s2025_s19 = sphi %s2118_s19, %s2710_s19   ;;  %s2021_s18 = sphi %s2116_s18, %s2709_s18  }
   0x4   : > { %s2141_s24 = sadd.s32 1, %s2033_s21   ;;  %s135_s25 = sadd.s32 1, %s2029_s20 }
   0x5   : > { %s132_s26 = ssub.s32 %s2033_s21, %s2141_s24  ;;  %p145_p0 = scmp.ne.s32.totalorder %s2029_s20, %s2025_s19 }
   0x6   : > { %p133_p1 = scmp.eq.s32.totalorder %s132_s26, 0  ;;  %p146_p2 = scmp.eq.s32.totalorder %s2137_s22, 1 }
   0x7   : > { %p151_p3 = scmp.ne.s32.totalorder %s2025_s19, %s2021_s18  ;;  %p152_p4 = scmp.eq.s32.totalorder %s1837_s23, 1 }
   0x8   : > { %s2152_s27 = scalar_select %p133_p1, %s2029_s20, %s135_s25  }
   0x9   : > { %p2154_p5 = por %p146_p2, %p145_p0  ;;  %p2158_p6 = por %p152_p4, %p151_p3 }
   0xa   : > { %p1840_p7 = scmp.ge.s32.totalorder %s2033_s21, 1  ;;  %p190_p8 = scmp.lt.s32.totalorder %s2033_s21, 3 }
   0xc   : > { %p191_p9 = pnand %p1840_p7, %p190_p8 }
   0xd   : > { %p218_p10 = scmp.lt.s32.totalorder (!%p191_p9), %s2137_s22, 1  ;;  %s2036_s10 = smov (!%p191_p9), 113  }
   0xe   : > { %194 = sbr.rel (%p191_p9) target bundleno = 1196 (0x4ac), region = 40  ;;  %s2037_s11 = smov (!%p191_p9), 114  }
   0xf   : > { %s2038_s12 = smov (!%p191_p9), 112   ;;  %s2039_s13 = smov (!%p191_p9), 125  }
  0x10   : > { %s2040_s14 = smov (!%p191_p9), 115   ;;  %s2041_s15 = smov (!%p191_p9), 127  }
  0x11   : > { %s2042_s16 = smov (!%p191_p9), 126   ;;  %s2043_s17 = smov (!%p191_p9), 1  }
  0x12   : > { %s2044_s23 = smov (!%p191_p9), 3   ;;  %s2045_s25 = smov (!%p191_p9), 2  }
  0x13   : > { %v2035_v0 = vmov 0.0   ;;  %s219_s30 = scalar_select %p218_p10, %s2137_s22, 1  ;;  %v227_v26 = vlaneseq  ;;  %vm994_vm0 = vcmask 916480   ;;  %vm947_vm1 = vcmask 932864  }
  0x14   : > { %224 = vst [vmem:[#allocation2 + $0x8] sm:$0xff] %v2035_v0  ;;  %223 = vst [vmem:[#allocation2] sm:$0xff] %v2035_v0  ;;  %s2046_s26 = smov 14   ;;  %s2049_s7 = smov 18   ;;  %vm973_vm4 = vcmask 924672   ;;  %vm901_vm6 = vcmask 1022976  }
  0x15   : > { %1380 = vst [vmem:[#allocation3 + $0xb8] sm:$0xf0] %v2035_v0  ;;  %1381 = vst [vmem:[#allocation3 + $0x88] sm:$0xf0] %v2035_v0  ;;  %s1852_s6 = sshll.u32 %s219_s30, 3  ;;  %s2047_s30 = smov 13  }
  0x16   : > { %1382 = vst [vmem:[#allocation3 + $0xa8] sm:$0xff] %v2035_v0  ;;  %s222_s9 = scalar_lea.vmem %s2701_s0, %s1852_s6  ;;  %s2048_s6 = smov 15   ;;  %v228_v28 = vand.u32 127, %v227_v26  ;;  %vm927_vm9 = vcmask 941056   ;;  %vm855_vm13 = vcmask 1039360   ;;  %vm881_vm15 = vcmask 1031168  }
  0x17   : > { %v2169_v1 = vld [vmem:[%s222_s9] sm:$0xff]  ;;  %s2050_s8 = smov 17   ;;  %s2051_s9 = smov 16  }
  0x18   : > { %226 = vst [vmem:[#allocation2 + $0x4] sm:$0xff] %v2169_v1  ;;  %v2174_v4 = vcombine.high %v2169_v1, %v2169_v1  ;;  %842 = vst [vmem:[#allocation3 + $0x1e8] sm:$0xf] %v2169_v1  ;;  %v2186_v8 = vcombine.low %v2169_v1, %v2169_v1  ;;  %v229_v29 = vadd.s32 128, %v228_v28  ;;  %v2232_v33 = vand.u32 15, %v228_v28 }
  0x1a   : > { %843 = vst [vmem:[#allocation3 + $0xf8] sm:$0xf] %v2174_v4  ;;  %v2234_v34 = vand.u32 15, %v229_v29  ;;  %v2238_v37 = vadd.s32 4294967294, %v2232_v33  ;;  %v2248_v42 = vadd.s32 4294967295, %v2232_v33  ;;  %v2318_v28 = vadd.s32 1, %v2232_v33 }
  0x1b   : > { %v963_v2 = vld [vmem:[#allocation2 + $0xc] sm:$0xf] }
  0x1c   : > { %v937_v3 = vld [vmem:[#allocation2 + $0xc] sm:$0xf]  ;;  %971 = vrot.lane.b32.xlu1 %v963_v2, %s2036_s10  ;;  %v2241_v38 = vadd.s32 4294967294, %v2234_v34  ;;  %v2254_v43 = vadd.s32 4294967295, %v2234_v34  ;;  %v2257_v44 = vadd.s32 3, %v2234_v34  ;;  %vm264_vm2 = vcmp.ge.s32.totalorder %v2238_v37, 0 }
  0x1d   : > { %945 = vrot.lane.b32.xlu0 %v937_v3, %s2037_s11  ;;  %v1953_v5 = vld [vmem:[#allocation2 + $0xc] ss:$0 sps:$4 sm:$0xff]   ;;  %vm272_vm5 = vcmp.ge.s32.totalorder %v2248_v42, 0  ;;  %v2272_v55 = vadd.s32 4294967293, %v2234_v34  ;;  %v2287_v2 = vadd.s32 3, %v2232_v33  ;;  %v2321_v29 = vadd.s32 2, %v2234_v34 }
  0x1e   : > { %v891_v6 = vld [vmem:[#allocation2 + $0xc] sm:$0xf]  ;;  %vm265_vm3 = vcmp.ge.s32.totalorder %v2241_v38, 0  ;;  %vm273_vm7 = vcmp.ge.s32.totalorder %v2254_v43, 0  ;;  %vm299_vm8 = vcmp.lt.s32.totalorder %v2257_v44, 16 }
  0x1f   : > { %v917_v7 = vld [vmem:[#allocation2 + $0xc] sm:$0xf]  ;;  %v2194_v11 = vld [vmem:[#allocation2] sm:$0xff]  ;;  %v813_v13 = vld [vmem:[#allocation2 + $0x8] sm:$0xf]  ;;  %vm257_vm10 = vcmp.ge.s32.totalorder %v2272_v55, 0 }
  0x20   : > { %992 = vrot.lane.b32.xlu1 %v1953_v5, %s2038_s12  ;;  %v845_v9 = vld [vmem:[#allocation2 + $0xc] sm:$0xf]  ;;  %v2199_v12 = vcombine.high %v2194_v11, %v2194_v11  ;;  %v767_v14 = vld [vmem:[#allocation2 + $0x8] sm:$0xf]  ;;  %v2222_v23 = vcombine.low %v2194_v11, %v2194_v11  ;;  %vm298_vm11 = vcmp.lt.s32.totalorder %v2287_v2, 16 }
  0x21   : > { %941 = vrot.lane.b32.xlu0 %v2169_v1, %s2037_s11  ;;  %v871_v10 = vld [vmem:[#allocation2 + $0xc] sm:$0xf]  ;;  %v793_v15 = vld [vmem:[#allocation2 + $0x8] sm:$0xf] }
  0x22   : > { %v721_v16 = vld [vmem:[#allocation2 + $0x8] sm:$0xf] }
  0x23   : > { %v747_v17 = vld [vmem:[#allocation2 + $0x8] sm:$0xf] }
  0x24   : > { %967 = vrot.lane.b32.xlu1 %v2169_v1, %s2036_s10  ;;  %v701_v18 = vld [vmem:[#allocation2 + $0x8] sm:$0xf] }
  0x25   : > { %990 = vrot.lane.b32.xlu0 %v2169_v1, %s2038_s12  ;;  %v636_v19 = vld [vmem:[#allocation2 + $0x8] sm:$0xf] }
  0x26   : > { %v662_v20 = vld [vmem:[#allocation2 + $0x8] sm:$0xf] }
  0x27   : > { %v1958_v21 = vld [vmem:[#allocation2 + $0x8] ss:$0 sps:$4 sm:$0xff]  }
  0x28   : > { %899 = vrot.lane.b32.xlu1 %v891_v6, %s2039_s13  ;;  %v590_v22 = vld [vmem:[#allocation2 + $0x8] sm:$0xf] }
  0x29   : > { %943 = vrot.lane.b32.xlu0 %v2174_v4, %s2037_s11  ;;  %s2053_s11 = smov 19   ;;  %v616_v24 = vld [vmem:[#allocation2 + $0x8] sm:$0xf] }
  0x2a   : > { %v544_v25 = vld [vmem:[#allocation2 + $0x8] sm:$0xf] }
  0x2b   : > { %v570_v27 = vld [vmem:[#allocation2 + $0x8] sm:$0xf] }
  0x2c   : > { %969 = vrot.lane.b32.xlu1 %v2174_v4, %s2036_s10  ;;  %s2052_s10 = smov 29   ;;  %v500_v32 = vld [vmem:[#allocation2 + $0x8] sm:$0xf] }
  0x2d   : > { %897 = vrot.lane.b32.xlu0 %v2174_v4, %s2039_s13  ;;  %v526_v45 = vld [vmem:[#allocation2 + $0x8] sm:$0xf] }
  0x2e   : > { %v454_v54 = vld [vmem:[#allocation2 + $0x8] sm:$0xf] }
  0x2f   : > { %v480_v3 = vld [vmem:[#allocation2 + $0x8] sm:$0xf] }
  0x30   : > { %925 = vrot.lane.b32.xlu1 %v917_v7, %s2040_s14 }
  0x31   : > { %923 = vrot.lane.b32.xlu0 %v2174_v4, %s2040_s14 }
  0x34   : > { %895 = vrot.lane.b32.xlu1 %v2169_v1, %s2039_s13  ;;  %s2055_s13 = smov 30  }
  0x35   : > { %988 = vrot.lane.b32.xlu0 %v2186_v8, %s2038_s12  ;;  %s2054_s12 = smov 31  }
  0x38   : > { %851 = vrot.lane.b32.xlu1 %v2174_v4, %s2041_s15 }
  0x39   : > { %921 = vrot.lane.b32.xlu0 %v2169_v1, %s2040_s14  ;;  %s2056_s14 = smov 33  }
  0x3c   : > { %877 = vrot.lane.b32.xlu1 %v2174_v4, %s2042_s16 }
  0x3d   : > { %853 = vrot.lane.b32.xlu0 %v845_v9, %s2041_s15 }
  0x40   : > { %849 = vrot.lane.b32.xlu1 %v2169_v1, %s2041_s15  ;;  %s2057_s15 = smov 32  }
  0x41   : > { %879 = vrot.lane.b32.xlu0 %v871_v10, %s2042_s16  ;;  %v2296_v10 = vadd.s32 4294967293, %v2232_v33 }
  0x43   : > { %vm256_vm12 = vcmp.ge.s32.totalorder %v2296_v10, 0 }
  0x44   : > { %819 = vrot.lane.b32.xlu1 %v2199_v12, %s2043_s17 }
  0x45   : > { %875 = vrot.lane.b32.xlu0 %v2169_v1, %s2042_s16  ;;  %s2058_s16 = smov 35  }
  0x48   : > { %817 = vrot.lane.b32.xlu1 %v2194_v11, %s2043_s17 }
  0x49   : > { %821 = vrot.lane.b32.xlu0 %v813_v13, %s2043_s17  ;;  %s2059_s17 = smov 34  }
  0x4c   : > { %775 = vrot.lane.b32.xlu1 %v767_v14, %s2044_s23 }
  0x4d   : > { %773 = vrot.lane.b32.xlu0 %v2199_v12, %s2044_s23 }
  0x50   : > { %801 = vrot.lane.b32.xlu1 %v793_v15, %s2045_s25 }
  0x51   : > { %799 = vrot.lane.b32.xlu0 %v2199_v12, %s2045_s25 }
  0x54   : > { %797 = vrot.lane.b32.xlu1 %v2194_v11, %s2045_s25  ;;  %s2061_s25 = smov 45  }
  0x55   : > { %771 = vrot.lane.b32.xlu0 %v2194_v11, %s2044_s23  ;;  %s2060_s23 = smov 46  }
  0x58   : > { %729 = vrot.lane.b32.xlu1 %v721_v16, %s2046_s26 }
  0x59   : > { %727 = vrot.lane.b32.xlu0 %v2199_v12, %s2046_s26 }
  0x5c   : > { %755 = vrot.lane.b32.xlu1 %v747_v17, %s2047_s30 }
  0x5d   : > { %753 = vrot.lane.b32.xlu0 %v2199_v12, %s2047_s30 }
  0x60   : > { %751 = vrot.lane.b32.xlu1 %v2194_v11, %s2047_s30  ;;  %s2063_s30 = smov 50  }
  0x61   : > { %725 = vrot.lane.b32.xlu0 %v2194_v11, %s2046_s26  ;;  %s2062_s26 = smov 47  }
  0x64   : > { %709 = vrot.lane.b32.xlu1 %v701_v18, %s2048_s6 }
  0x65   : > { %707 = vrot.lane.b32.xlu0 %v2199_v12, %s2048_s6 }
  0x68   : > { %642 = vrot.lane.b32.xlu1 %v2199_v12, %s2049_s7 }
  0x69   : > { %705 = vrot.lane.b32.xlu0 %v2194_v11, %s2048_s6  ;;  %s2064_s6 = smov 49  }
  0x6c   : > { %668 = vrot.lane.b32.xlu1 %v2199_v12, %s2050_s8 }
  0x6d   : > { %644 = vrot.lane.b32.xlu0 %v636_v19, %s2049_s7 }
  0x70   : > { %640 = vrot.lane.b32.xlu1 %v2194_v11, %s2049_s7  ;;  %s2065_s7 = smov 48  }
  0x71   : > { %670 = vrot.lane.b32.xlu0 %v662_v20, %s2050_s8  ;;  %v408_v20 = vld [vmem:[#allocation2 + $0x8] sm:$0xf] }
  0x74   : > { %689 = vrot.lane.b32.xlu1 %v2194_v11, %s2051_s9 }
  0x75   : > { %666 = vrot.lane.b32.xlu0 %v2194_v11, %s2050_s8  ;;  %s2066_s8 = smov 51  }
  0x78   : > { %596 = vrot.lane.b32.xlu1 %v2199_v12, %s2052_s10 }
  0x79   : > { %691 = vrot.lane.b32.xlu0 %v1958_v21, %s2051_s9  ;;  %v2308_v21 = vadd.s32 1, %v2234_v34  ;;  %v2330_v34 = vadd.s32 2, %v2232_v33  ;;  %v388_v33 = vld [vmem:[#allocation2 + $0x8] sm:$0xf] }
  0x7b   : > { %vm283_vm14 = vcmp.lt.s32.totalorder %v2308_v21, 16  ;;  %v1398_v21 = vld [vmem:[%s2702_s1 + $0x10] sm:$0xff] }
  0x7c   : > { %622 = vrot.lane.b32.xlu1 %v2199_v12, %s2053_s11 }
  0x7d   : > { %598 = vrot.lane.b32.xlu0 %v590_v22, %s2052_s10 }
  0x80   : > { %687 = vrot.lane.b32.xlu1 %v2222_v23, %s2051_s9  ;;  %s2067_s9 = smov 78  }
  0x81   : > { %624 = vrot.lane.b32.xlu0 %v616_v24, %s2053_s11 }
  0x84   : > { %620 = vrot.lane.b32.xlu1 %v2194_v11, %s2053_s11  ;;  %s2069_s11 = smov 79  }
  0x85   : > { %594 = vrot.lane.b32.xlu0 %v2194_v11, %s2052_s10  ;;  %s2068_s10 = smov 77  }
  0x88   : > { %552 = vrot.lane.b32.xlu1 %v544_v25, %s2054_s12 }
  0x89   : > { %550 = vrot.lane.b32.xlu0 %v2199_v12, %s2054_s12 }
  0x8c   : > { %578 = vrot.lane.b32.xlu1 %v570_v27, %s2055_s13  ;;  %v434_v27 = vld [vmem:[#allocation2 + $0x8] sm:$0xf] }
  0x8d   : > { %576 = vrot.lane.b32.xlu0 %v2199_v12, %s2055_s13 }
  0x8e   : > { %v972_v30 = vpop.permute.xlu1 %971 }
  0x8f   : > { %v946_v31 = vpop.permute.xlu0 %945 }
  0x90   : > { %574 = vrot.lane.b32.xlu1 %v2194_v11, %s2055_s13  ;;  %s2071_s13 = smov 81  }
  0x91   : > { %548 = vrot.lane.b32.xlu0 %v2194_v11, %s2054_s12  ;;  %s2070_s12 = smov 82  }
  0x92   : > { %v993_v35 = vpop.permute.xlu1 %992 }
  0x93   : > { %v942_v36 = vpop.permute.xlu0 %941 }
  0x94   : > { %508 = vrot.lane.b32.xlu1 %v500_v32, %s2056_s14 }
  0x95   : > { %506 = vrot.lane.b32.xlu0 %v2199_v12, %s2056_s14 }
  0x96   : > { %v968_v39 = vpop.permute.xlu1 %967 }
  0x97   : > { %v2243_v40 = vpop.permute.xlu0 %990 }
  0x98   : > { %v996_v41 = vsel %vm994_vm0, %v2243_v40, %v993_v35  ;;  %532 = vrot.lane.b32.xlu1 %v2199_v12, %s2057_s15 }
  0x99   : > { %1000 = vst [vmem:[#allocation3 + $0x8] sm:$0xf0] %v996_v41  ;;  %504 = vrot.lane.b32.xlu0 %v2194_v11, %s2056_s14  ;;  %s2072_s14 = smov 80  }
  0x9a   : > { %v900_v46 = vpop.permute.xlu1 %899 }
  0x9b   : > { %v944_v47 = vpop.permute.xlu0 %943 }
  0x9c   : > { %v948_v48 = vsel %vm947_vm1, %v942_v36, %v944_v47  ;;  %v949_v49 = vsel %vm947_vm1, %v944_v47, %v946_v31  ;;  %460 = vrot.lane.b32.xlu1 %v2199_v12, %s2058_s16  ;;  %vm291_vm1 = vcmp.lt.s32.totalorder %v2321_v29, 16 }
  0x9d   : > { %v952_v50 = vsel %vm264_vm2, %v948_v48, 0.0  ;;  %v953_v51 = vsel %vm265_vm3, %v949_v49, 0.0  ;;  %534 = vrot.lane.b32.xlu0 %v526_v45, %s2057_s15 }
  0x9e   : > { %v956_v52 = vrot.slane %v952_v50, 4  ;;  %v957_v53 = vrot.slane %v953_v51, 4  ;;  %v970_v56 = vpop.permute.xlu1 %969 }
  0x9f   : > { %v898_v57 = vpop.permute.xlu0 %897  ;;  %v974_v58 = vsel %vm973_vm4, %v968_v39, %v970_v56  ;;  %v975_v59 = vsel %vm973_vm4, %v970_v56, %v972_v30  ;;  %vm290_vm4 = vcmp.lt.s32.totalorder %v2330_v34, 16 }
  0xa0   : > { %960 = vst [vmem:[#allocation3 + $0x1e0] sm:$0xf0] %v956_v52  ;;  %961 = vst [vmem:[#allocation3] sm:$0xf0] %v957_v53  ;;  %v903_v60 = vsel %vm901_vm6, %v898_v57, %v900_v46  ;;  %v978_v61 = vsel %vm272_vm5, %v974_v58, 0.0  ;;  %v979_v62 = vsel %vm273_vm7, %v975_v59, 0.0  ;;  %486 = vrot.lane.b32.xlu1 %v2199_v12, %s2059_s17 }
  0xa1   : > { %v907_v63 = vsel %vm299_vm8, %v903_v60, 0.0  ;;  %462 = vrot.lane.b32.xlu0 %v454_v54, %s2058_s16  ;;  %980 = vst [vmem:[#allocation3 + $0xf0] sm:$0xf] %v978_v61  ;;  %981 = vst [vmem:[#allocation3 + $0x8] sm:$0xf] %v979_v62 }
  0xa2   : > { %v911_v0 = vrot.slane %v907_v63, 4  ;;  %v926_v5 = vpop.permute.xlu1 %925 }
  0xa3   : > { %v924_v6 = vpop.permute.xlu0 %923 }
  0xa4   : > { %915 = vst [vmem:[#allocation3 + $0x30] sm:$0xf0] %v911_v0  ;;  %v929_v7 = vsel %vm927_vm9, %v924_v6, %v926_v5  ;;  %530 = vrot.lane.b32.xlu1 %v2194_v11, %s2057_s15  ;;  %s2073_s15 = smov 93  }
  0xa5   : > { %v933_v9 = vsel %vm257_vm10, %v929_v7, 0.0  ;;  %488 = vrot.lane.b32.xlu0 %v480_v3, %s2059_s17  ;;  %v323_v7 = vld [vmem:[#allocation2 + $0x8] sm:$0xf] }
  0xa6   : > { %935 = vst [vmem:[#allocation3] sm:$0xf] %v933_v9  ;;  %v896_v13 = vpop.permute.xlu1 %895 }
  0xa7   : > { %v989_v14 = vpop.permute.xlu0 %988  ;;  %v902_v15 = vsel %vm901_vm6, %v896_v13, %v898_v57  ;;  %vm823_vm6 = vcmask 7168  }
  0xa8   : > { %v995_v16 = vsel %vm994_vm0, %v989_v14, %v2243_v40  ;;  %v906_v17 = vsel %vm298_vm11, %v902_v15, 0.0  ;;  %484 = vrot.lane.b32.xlu1 %v2194_v11, %s2059_s17  ;;  %v1431_v18 = vld [vmem:[#allocation3 + $0x8] sm:$0xff]  ;;  %vm282_vm0 = vcmp.lt.s32.totalorder %v2318_v28, 16  ;;  %s2075_s17 = smov 95  }
  0xa9   : > { %999 = vst [vmem:[#allocation3 + $0xf0] sm:$0xf0] %v995_v16  ;;  %458 = vrot.lane.b32.xlu0 %v2194_v11, %s2058_s16  ;;  %v910_v19 = vrot.slane %v906_v17, 4  ;;  %1476 = vmatprep.subr.mxu0 %v1431_v18  ;;  %s2074_s16 = smov 83   ;;  %v1399_v28 = vld [vmem:[%s2702_s1 + $0x18] sm:$0xff] }
  0xaa   : > { %v852_v22 = vpop.permute.xlu1 %851 }
  0xab   : > { %v922_v24 = vpop.permute.xlu0 %921  ;;  %914 = vst [vmem:[#allocation3 + $0x160] sm:$0xf0] %v910_v19 }
  0xac   : > { %v928_v25 = vsel %vm927_vm9, %v922_v24, %v924_v6  ;;  %416 = vrot.lane.b32.xlu1 %v408_v20, %s2060_s23  ;;  %vm777_vm9 = vcmask 23552   ;;  %v349_v20 = vld [vmem:[#allocation2 + $0x8] sm:$0xf] }
  0xad   : > { %v932_v26 = vsel %vm256_vm12, %v928_v25, 0.0  ;;  %414 = vrot.lane.b32.xlu0 %v2199_v12, %s2060_s23  ;;  %v1429_v39 = vld [vmem:[#allocation3] sm:$0xff] }
  0xae   : > { %934 = vst [vmem:[#allocation3 + $0x1e0] sm:$0xf] %v932_v26  ;;  %v878_v30 = vpop.permute.xlu1 %877 }
  0xaf   : > { %v854_v31 = vpop.permute.xlu0 %853 }
  0xb0   : > { %v857_v32 = vsel %vm855_vm13, %v852_v22, %v854_v31  ;;  %v1430_v35 = vld [vmem:[#allocation3 + $0xf0] sm:$0xff]  ;;  %442 = vrot.lane.b32.xlu1 %v434_v27, %s2061_s25 }
  0xb1   : > { %v861_v36 = vsel %vm283_vm14, %v857_v32, 0.0  ;;  %1477 = vmatpush1.msra.mxu0 %v1430_v35  ;;  %440 = vrot.lane.b32.xlu0 %v2199_v12, %s2061_s25 }
  0xb2   : > { %v865_v40 = vrot.slane %v861_v36, 4  ;;  %1478 = vmatprep.subr.mxu0 %v1429_v39  ;;  %v850_v41 = vpop.permute.xlu1 %849  ;;  %v1959_v36 = vld [vmem:[#allocation2 + $0x8] ss:$0 sps:$4 sm:$0xff]  }
  0xb3   : > { %v880_v45 = vpop.permute.xlu0 %879  ;;  %v856_v46 = vsel %vm855_vm13, %v850_v41, %v852_v22  ;;  %vm803_vm13 = vcmask 15360  }
  0xb4   : > { %869 = vst [vmem:[#allocation3 + $0xf8] sm:$0xf0] %v865_v40  ;;  %v883_v47 = vsel %vm881_vm15, %v878_v30, %v880_v45  ;;  %v860_v48 = vsel %vm282_vm0, %v856_v46, 0.0  ;;  %438 = vrot.lane.b32.xlu1 %v2194_v11, %s2061_s25  ;;  %s2077_s25 = smov 97  }
  0xb5   : > { %v887_v49 = vsel %vm291_vm1, %v883_v47, 0.0  ;;  %v1428_v50 = vld [vmem:[#allocation3 + $0x1e0] sm:$0xff]  ;;  %v864_v51 = vrot.slane %v860_v48, 4  ;;  %412 = vrot.lane.b32.xlu0 %v2194_v11, %s2060_s23  ;;  %s2076_s23 = smov 94  }
  0xb6   : > { %889 = vst [vmem:[#allocation3 + $0x30] sm:$0xf] %v887_v49  ;;  %1479 = vmatpush1.msra.mxu0 %v1428_v50  ;;  %v820_v52 = vpop.permute.xlu1 %819  ;;  %v303_v50 = vld [vmem:[#allocation2 + $0x8] sm:$0xf] }
  0xb7   : > { %v876_v53 = vpop.permute.xlu0 %875  ;;  %868 = vst [vmem:[#allocation3 + $0x1e8] sm:$0xf0] %v864_v51 }
  0xb8   : > { %v882_v54 = vsel %vm881_vm15, %v876_v53, %v878_v30  ;;  %396 = vrot.lane.b32.xlu1 %v388_v33, %s2062_s26  ;;  %vm731_vm15 = vcmask 113664  }
  0xb9   : > { %v886_v56 = vsel %vm290_vm4, %v882_v54, 0.0  ;;  %394 = vrot.lane.b32.xlu0 %v2199_v12, %s2062_s26 }
  0xba   : > { %888 = vst [vmem:[#allocation3 + $0x160] sm:$0xf] %v886_v56  ;;  %v818_v57 = vpop.permute.xlu1 %817 }
  0xbb   : > { %v822_v58 = vpop.permute.xlu0 %821  ;;  %v824_v59 = vsel %vm823_vm6, %v818_v57, %v820_v52  ;;  %v1425_v16 = vld [vmem:[#allocation3 + $0xf8] sm:$0xff] }
  0xbc   : > { %v825_v60 = vsel %vm823_vm6, %v820_v52, %v822_v58  ;;  %v828_v61 = vsel %vm272_vm5, %v824_v59, 0.0  ;;  %329 = vrot.lane.b32.xlu1 %v2199_v12, %s2063_s30  ;;  %vm757_vm6 = vcmask 105472  }
  0xbd   : > { %v829_v62 = vsel %vm273_vm7, %v825_v60, 0.0  ;;  %v1427_v63 = vld [vmem:[#allocation3 + $0x30] sm:$0xff]  ;;  %v832_v0 = vrot.slane %v828_v61, 4  ;;  %392 = vrot.lane.b32.xlu0 %v2194_v11, %s2062_s26  ;;  %v1335_v61 = vld [vmem:[#allocation2 + $0xc] sm:$0xf]  ;;  %s2078_s26 = smov 96  }
  0xbe   : > { %v833_v3 = vrot.slane %v829_v62, 4  ;;  %1480 = vmatprep.subr.mxu0 %v1427_v63  ;;  %v776_v5 = vpop.permute.xlu1 %775  ;;  %v1424_v19 = vld [vmem:[#allocation3 + $0x1e8] sm:$0xff] }
  0xbf   : > { %v774_v6 = vpop.permute.xlu0 %773  ;;  %836 = vst [vmem:[#allocation3 + $0x1b8] sm:$0xf0] %v832_v0 }
  0xc0   : > { %837 = vst [vmem:[#allocation3 + $0x28] sm:$0xf0] %v833_v3  ;;  %v779_v9 = vsel %vm777_vm9, %v774_v6, %v776_v5  ;;  %355 = vrot.lane.b32.xlu1 %v2199_v12, %s2064_s6 }
  0xc1   : > { %v783_v13 = vsel %vm257_vm10, %v779_v9, 0.0  ;;  %v1426_v14 = vld [vmem:[#allocation3 + $0x160] sm:$0xff]  ;;  %331 = vrot.lane.b32.xlu0 %v323_v7, %s2063_s30 }
  0xc2   : > { %v787_v15 = vrot.slane %v783_v13, 4  ;;  %1481 = vmatpush1.msra.mxu0 %v1426_v14  ;;  %v802_v17 = vpop.permute.xlu1 %801 }
  0xc3   : > { %1482 = vmatprep.subr.mxu0 %v1425_v16  ;;  %v800_v18 = vpop.permute.xlu0 %799 }
  0xc4   : > { %791 = vst [vmem:[#allocation3 + $0x1a8] sm:$0xf0] %v787_v15  ;;  %v805_v22 = vsel %vm803_vm13, %v800_v18, %v802_v17  ;;  %1483 = vmatpush1.msra.mxu0 %v1424_v19  ;;  %327 = vrot.lane.b32.xlu1 %v2194_v11, %s2063_s30  ;;  %s2079_s30 = smov 99  }
  0xc5   : > { %v809_v24 = vsel %vm265_vm3, %v805_v22, 0.0  ;;  %357 = vrot.lane.b32.xlu0 %v349_v20, %s2064_s6  ;;  %v1315_v22 = vld [vmem:[#allocation2 + $0xc] sm:$0xf] }
  0xc6   : > { %811 = vst [vmem:[#allocation3 + $0x28] sm:$0xf] %v809_v24  ;;  %v798_v25 = vpop.permute.xlu1 %797 }
  0xc7   : > { %v772_v26 = vpop.permute.xlu0 %771  ;;  %v804_v27 = vsel %vm803_vm13, %v798_v25, %v800_v18  ;;  %vm646_vm13 = vcmask 146432  }
  0xc8   : > { %v778_v30 = vsel %vm777_vm9, %v772_v26, %v774_v6  ;;  %v808_v31 = vsel %vm264_vm2, %v804_v27, 0.0  ;;  %376 = vrot.lane.b32.xlu1 %v2194_v11, %s2065_s7  ;;  %vm711_vm9 = vcmask 121856   ;;  %v1361_v6 = vld [vmem:[#allocation2 + $0xc] sm:$0xf] }
  0xc9   : > { %v782_v32 = vsel %vm256_vm12, %v778_v30, 0.0  ;;  %810 = vst [vmem:[#allocation3 + $0x1b8] sm:$0xf] %v808_v31  ;;  %353 = vrot.lane.b32.xlu0 %v2194_v11, %s2064_s6  ;;  %s2080_s6 = smov 98  }
  0xca   : > { %v786_v35 = vrot.slane %v782_v32, 4  ;;  %v730_v39 = vpop.permute.xlu1 %729  ;;  %v1250_v32 = vld [vmem:[#allocation2 + $0xc] sm:$0xf] }
  0xcb   : > { %v728_v40 = vpop.permute.xlu0 %727 }
  0xcc   : > { %790 = vst [vmem:[#allocation3 + $0x80] sm:$0xf0] %v786_v35  ;;  %v733_v41 = vsel %vm731_vm15, %v728_v40, %v730_v39  ;;  %309 = vrot.lane.b32.xlu1 %v2199_v12, %s2066_s8 }
  0xcd   : > { %v737_v45 = vsel %vm291_vm1, %v733_v41, 0.0  ;;  %v1423_v46 = vld [vmem:[#allocation3 + $0x28] sm:$0xff]  ;;  %378 = vrot.lane.b32.xlu0 %v1959_v36, %s2065_s7  ;;  %v1276_v41 = vld [vmem:[#allocation2 + $0xc] sm:$0xf] }
  0xce   : > { %v741_v47 = vrot.slane %v737_v45, 4  ;;  %1484 = vmatprep.subr.mxu0 %v1423_v46  ;;  %v756_v48 = vpop.permute.xlu1 %755 }
  0xcf   : > { %v754_v49 = vpop.permute.xlu0 %753 }
  0xd0   : > { %745 = vst [vmem:[#allocation3 + $0x140] sm:$0xf0] %v741_v47  ;;  %v759_v51 = vsel %vm757_vm6, %v754_v49, %v756_v48  ;;  %374 = vrot.lane.b32.xlu1 %v2222_v23, %s2065_s7  ;;  %v1422_v52 = vld [vmem:[#allocation3 + $0x1b8] sm:$0xff]  ;;  %s2081_s7 = smov 110  }
  0xd1   : > { %v763_v33 = vsel %vm299_vm8, %v759_v51, 0.0  ;;  %1485 = vmatpush1.msra.mxu0 %v1422_v52  ;;  %311 = vrot.lane.b32.xlu0 %v303_v50, %s2066_s8 }
  0xd2   : > { %765 = vst [vmem:[#allocation3 + $0x1a8] sm:$0xf] %v763_v33  ;;  %v752_v12 = vpop.permute.xlu1 %751  ;;  %v1960_v33 = vld [vmem:[#allocation2 + $0xc] ss:$0 sps:$4 sm:$0xff]  }
  0xd3   : > { %v726_v53 = vpop.permute.xlu0 %725  ;;  %v758_v54 = vsel %vm757_vm6, %v752_v12, %v754_v49  ;;  %vm693_vm6 = vcmask 130048  }
  0xd4   : > { %v732_v56 = vsel %vm731_vm15, %v726_v53, %v728_v40  ;;  %v762_v57 = vsel %vm298_vm11, %v758_v54, 0.0  ;;  %1341 = vrot.lane.b32.xlu1 %v2174_v4, %s2067_s9  ;;  %vm672_vm15 = vcmask 138240  }
  0xd5   : > { %v736_v58 = vsel %vm290_vm4, %v732_v56, 0.0  ;;  %764 = vst [vmem:[#allocation3 + $0x80] sm:$0xf] %v762_v57  ;;  %307 = vrot.lane.b32.xlu0 %v2194_v11, %s2066_s8  ;;  %s2082_s8 = smov 109  }
  0xd6   : > { %v740_v23 = vrot.slane %v736_v58, 4  ;;  %v710_v59 = vpop.permute.xlu1 %709 }
  0xd7   : > { %v708_v60 = vpop.permute.xlu0 %707 }
  0xd8   : > { %744 = vst [vmem:[#allocation3 + $0x138] sm:$0xf0] %v740_v23  ;;  %v713_v62 = vsel %vm711_vm9, %v708_v60, %v710_v59  ;;  %1367 = vrot.lane.b32.xlu1 %v2174_v4, %s2068_s10  ;;  %v1204_v23 = vld [vmem:[#allocation2 + $0xc] sm:$0xf] }
  0xd9   : > { %v717_v63 = vsel %vm283_vm14, %v713_v62, 0.0  ;;  %v1421_v0 = vld [vmem:[#allocation3 + $0x1a8] sm:$0xff]  ;;  %1343 = vrot.lane.b32.xlu0 %v1335_v61, %s2067_s9  ;;  %v2428_v61 = vld [vmem:[#allocation2 + $0x4] sm:$0xff] }
  0xda   : > { %719 = vst [vmem:[#allocation3 + $0x140] sm:$0xf] %v717_v63  ;;  %1486 = vmatprep.subr.mxu0 %v1421_v0  ;;  %v643_v3 = vpop.permute.xlu1 %642 }
  0xdb   : > { %v706_v5 = vpop.permute.xlu0 %705 }
  0xdc   : > { %v712_v11 = vsel %vm711_vm9, %v706_v5, %v708_v60  ;;  %1339 = vrot.lane.b32.xlu1 %v2169_v1, %s2067_s9  ;;  %v1420_v9 = vld [vmem:[#allocation3 + $0x80] sm:$0xff]  ;;  %vm600_vm9 = vcmask 236544   ;;  %s2083_s9 = smov 111  }
  0xdd   : > { %v716_v7 = vsel %vm282_vm0, %v712_v11, 0.0  ;;  %1487 = vmatpush1.msra.mxu0 %v1420_v9  ;;  %1369 = vrot.lane.b32.xlu0 %v1361_v6, %s2068_s10  ;;  %v1230_v6 = vld [vmem:[#allocation2 + $0xc] sm:$0xf]  ;;  %v2439_v11 = vcombine.high %v2428_v61, %v2428_v61 }
  0xde   : > { %718 = vst [vmem:[#allocation3 + $0x138] sm:$0xf] %v716_v7  ;;  %v669_v13 = vpop.permute.xlu1 %668 }
  0xdf   : > { %v645_v14 = vpop.permute.xlu0 %644 }
  0xe0   : > { %v648_v15 = vsel %vm646_vm13, %v643_v3, %v645_v14  ;;  %1321 = vrot.lane.b32.xlu1 %v2174_v4, %s2069_s11 }
  0xe1   : > { %v652_v16 = vsel %vm265_vm3, %v648_v15, 0.0  ;;  %v1419_v17 = vld [vmem:[#allocation3 + $0x140] sm:$0xff]  ;;  %1365 = vrot.lane.b32.xlu0 %v2169_v1, %s2068_s10 }
  0xe2   : > { %v656_v18 = vrot.slane %v652_v16, 4  ;;  %1488 = vmatprep.subr.mxu0 %v1419_v17  ;;  %v641_v19 = vpop.permute.xlu1 %640 }
  0xe3   : > { %v671_v20 = vpop.permute.xlu0 %670  ;;  %v647_v24 = vsel %vm646_vm13, %v641_v19, %v643_v3  ;;  %vm626_vm13 = vcmask 154624  }
  0xe4   : > { %660 = vst [vmem:[#allocation3 + $0x60] sm:$0xf0] %v656_v18  ;;  %v674_v25 = vsel %vm672_vm15, %v669_v13, %v671_v20  ;;  %v651_v26 = vsel %vm264_vm2, %v647_v24, 0.0  ;;  %1319 = vrot.lane.b32.xlu1 %v2169_v1, %s2069_s11 }
  0xe5   : > { %v678_v27 = vsel %vm273_vm7, %v674_v25, 0.0  ;;  %v1418_v30 = vld [vmem:[#allocation3 + $0x138] sm:$0xff]  ;;  %v655_v31 = vrot.slane %v651_v26, 4  ;;  %1323 = vrot.lane.b32.xlu0 %v1315_v22, %s2069_s11 }
  0xe6   : > { %680 = vst [vmem:[#allocation3 + $0x188] sm:$0xf] %v678_v27  ;;  %1489 = vmatpush1.msra.mxu0 %v1418_v30  ;;  %v690_v35 = vpop.permute.xlu1 %689 }
  0xe7   : > { %v667_v36 = vpop.permute.xlu0 %666  ;;  %659 = vst [vmem:[#allocation3 + $0x108] sm:$0xf0] %v655_v31 }
  0xe8   : > { %v673_v39 = vsel %vm672_vm15, %v667_v36, %v669_v13  ;;  %1258 = vrot.lane.b32.xlu1 %v1250_v32, %s2070_s12  ;;  %vm554_vm15 = vcmask 252928  }
  0xe9   : > { %v677_v40 = vsel %vm272_vm5, %v673_v39, 0.0  ;;  %1256 = vrot.lane.b32.xlu0 %v2174_v4, %s2070_s12 }
  0xea   : > { %679 = vst [vmem:[#allocation3 + $0xe0] sm:$0xf] %v677_v40  ;;  %v597_v45 = vpop.permute.xlu1 %596 }
  0xeb   : > { %v692_v46 = vpop.permute.xlu0 %691 }
  0xec   : > { %v695_v47 = vsel %vm693_vm6, %v690_v35, %v692_v46  ;;  %1284 = vrot.lane.b32.xlu1 %v1276_v41, %s2071_s13 }
  0xed   : > { %699 = vst [vmem:[#allocation3 + $0x188] sm:$0xf0] %v695_v47  ;;  %1282 = vrot.lane.b32.xlu0 %v2174_v4, %s2071_s13  ;;  %v1184_v47 = vld [vmem:[#allocation2 + $0xc] sm:$0xf] }
  0xee   : > { %v623_v48 = vpop.permute.xlu1 %622 }
  0xef   : > { %v599_v49 = vpop.permute.xlu0 %598 }
  0xf0   : > { %v602_v50 = vsel %vm600_vm9, %v597_v45, %v599_v49  ;;  %1280 = vrot.lane.b32.xlu1 %v2169_v1, %s2071_s13 }
  0xf1   : > { %v606_v51 = vsel %vm299_vm8, %v602_v50, 0.0  ;;  %1254 = vrot.lane.b32.xlu0 %v2169_v1, %s2070_s12 }
  0xf2   : > { %v610_v52 = vrot.slane %v606_v51, 4  ;;  %v688_v12 = vpop.permute.xlu1 %687 }
  0xf3   : > { %v625_v53 = vpop.permute.xlu0 %624  ;;  %v694_v54 = vsel %vm693_vm6, %v688_v12, %v690_v35  ;;  %vm580_vm6 = vcmask 244736   ;;  %v1158_v35 = vld [vmem:[#allocation2 + $0xc] sm:$0xf] }
  0xf4   : > { %614 = vst [vmem:[#allocation3 + $0x150] sm:$0xf0] %v610_v52  ;;  %v628_v56 = vsel %vm626_vm13, %v623_v48, %v625_v53  ;;  %v1417_v57 = vld [vmem:[#allocation3 + $0x188] sm:$0xff]  ;;  %698 = vst [vmem:[#allocation3 + $0xe0] sm:$0xf0] %v694_v54  ;;  %1305 = vrot.lane.b32.xlu1 %v1960_v33, %s2072_s14 }
  0xf5   : > { %v632_v58 = vsel %vm257_vm10, %v628_v56, 0.0  ;;  %1490 = vmatprep.subr.mxu0 %v1417_v57  ;;  %1303 = vrot.lane.b32.xlu0 %v2169_v1, %s2072_s14  ;;  %v1114_v56 = vld [vmem:[#allocation2 + $0xc] sm:$0xf] }
  0xf6   : > { %634 = vst [vmem:[#allocation3 + $0x60] sm:$0xf] %v632_v58  ;;  %v621_v59 = vpop.permute.xlu1 %620 }
  0xf7   : > { %v595_v60 = vpop.permute.xlu0 %594  ;;  %v627_v62 = vsel %vm626_vm13, %v621_v59, %v623_v48  ;;  %vm536_vm13 = vcmask 261120   ;;  %v1140_v59 = vld [vmem:[#allocation2 + $0xc] sm:$0xf] }
  0xf8   : > { %v601_v63 = vsel %vm600_vm9, %v595_v60, %v597_v45  ;;  %v631_v0 = vsel %vm256_vm12, %v627_v62, 0.0  ;;  %1212 = vrot.lane.b32.xlu1 %v1204_v23, %s2073_s15  ;;  %vm510_vm9 = vcmask 269312  }
  0xf9   : > { %v605_v3 = vsel %vm298_vm11, %v601_v63, 0.0  ;;  %633 = vst [vmem:[#allocation3 + $0x108] sm:$0xf] %v631_v0  ;;  %1210 = vrot.lane.b32.xlu0 %v2174_v4, %s2073_s15 }
  0xfa   : > { %v609_v5 = vrot.slane %v605_v3, 4  ;;  %v553_v7 = vpop.permute.xlu1 %552 }
  0xfb   : > { %v551_v9 = vpop.permute.xlu0 %550  ;;  %v1416_v13 = vld [vmem:[#allocation3 + $0xe0] sm:$0xff] }
  0xfc   : > { %613 = vst [vmem:[#allocation3 + $0x120] sm:$0xf0] %v609_v5  ;;  %v556_v14 = vsel %vm554_vm15, %v551_v9, %v553_v7  ;;  %1491 = vmatpush1.msra.mxu0 %v1416_v13  ;;  %1238 = vrot.lane.b32.xlu1 %v1230_v6, %s2074_s16  ;;  %v1068_v6 = vld [vmem:[#allocation2 + $0xc] sm:$0xf] }
  0xfd   : > { %v560_v15 = vsel %vm283_vm14, %v556_v14, 0.0  ;;  %v1415_v16 = vld [vmem:[#allocation3 + $0x60] sm:$0xff]  ;;  %1236 = vrot.lane.b32.xlu0 %v2439_v11, %s2074_s16 }
  0xfe   : > { %v564_v4 = vrot.slane %v560_v15, 4  ;;  %1492 = vmatprep.subr.mxu0 %v1415_v16  ;;  %v579_v17 = vpop.permute.xlu1 %578 }
  0xff   : > { %v577_v18 = vpop.permute.xlu0 %576 }
 0x100   : > { %568 = vst [vmem:[#allocation3 + $0x98] sm:$0xf0] %v564_v4  ;;  %v582_v19 = vsel %vm580_vm6, %v577_v18, %v579_v17  ;;  %1208 = vrot.lane.b32.xlu1 %v2169_v1, %s2073_s15  ;;  %v1414_v22 = vld [vmem:[#allocation3 + $0x108] sm:$0xff]  ;;  %v1094_v17 = vld [vmem:[#allocation2 + $0xc] sm:$0xf] }
 0x101   : > { %v586_v20 = vsel %vm291_vm1, %v582_v19, 0.0  ;;  %1493 = vmatpush1.msra.mxu0 %v1414_v22  ;;  %1301 = vrot.lane.b32.xlu0 %v2186_v8, %s2072_s14  ;;  %s215_s14 = sand.u32 1, %s2025_s19  }
 0x102   : > { %588 = vst [vmem:[#allocation3 + $0x150] sm:$0xf] %v586_v20  ;;  %v575_v24 = vpop.permute.xlu1 %574  ;;  %s1841_s15 = sshll.u32 %s215_s14, 3 }
 0x103   : > { %v549_v25 = vpop.permute.xlu0 %548  ;;  %v581_v26 = vsel %vm580_vm6, %v575_v24, %v577_v18  ;;  %vm490_vm6 = vcmask 277504  }
 0x104   : > { %v555_v27 = vsel %vm554_vm15, %v549_v25, %v551_v9  ;;  %v585_v30 = vsel %vm290_vm4, %v581_v26, 0.0  ;;  %1164 = vrot.lane.b32.xlu1 %v2439_v11, %s2075_s17  ;;  %vm464_vm15 = vcmask 285696  }
 0x105   : > { %v559_v31 = vsel %vm282_vm0, %v555_v27, 0.0  ;;  %587 = vst [vmem:[#allocation3 + $0x120] sm:$0xf] %v585_v30  ;;  %1234 = vrot.lane.b32.xlu0 %v2428_v61, %s2074_s16  ;;  %s1853_s16 = sshll.u32 %s2137_s22, 7 }
 0x106   : > { %v563_v1 = vrot.slane %v559_v31, 4  ;;  %v509_v8 = vpop.permute.xlu1 %508 }
 0x107   : > { %v507_v32 = vpop.permute.xlu0 %506 }
 0x108   : > { %567 = vst [vmem:[#allocation3 + $0x118] sm:$0xf0] %v563_v1  ;;  %v512_v36 = vsel %vm510_vm9, %v507_v32, %v509_v8  ;;  %1190 = vrot.lane.b32.xlu1 %v2439_v11, %s2076_s23 }
 0x109   : > { %v516_v39 = vsel %vm273_vm7, %v512_v36, 0.0  ;;  %v1413_v40 = vld [vmem:[#allocation3 + $0x150] sm:$0xff]  ;;  %1166 = vrot.lane.b32.xlu0 %v1158_v35, %s2075_s17 }
 0x10a   : > { %v520_v41 = vrot.slane %v516_v39, 4  ;;  %1494 = vmatprep.subr.mxu0 %v1413_v40  ;;  %v533_v45 = vpop.permute.xlu1 %532 }
 0x10b   : > { %v505_v46 = vpop.permute.xlu0 %504 }
 0x10c   : > { %524 = vst [vmem:[#allocation3 + $0x110] sm:$0xf0] %v520_v41  ;;  %v511_v48 = vsel %vm510_vm9, %v505_v46, %v507_v32  ;;  %1162 = vrot.lane.b32.xlu1 %v2428_v61, %s2075_s17  ;;  %v1412_v50 = vld [vmem:[#allocation3 + $0x120] sm:$0xff]  ;;  %vm418_vm9 = vcmask 375808   ;;  %s217_s17 = scalar_lea.vmem [#allocation4], %s1841_s15 }
 0x10d   : > { %v515_v49 = vsel %vm272_vm5, %v511_v48, 0.0  ;;  %1495 = vmatpush1.msra.mxu0 %v1412_v50  ;;  %1192 = vrot.lane.b32.xlu0 %v1184_v47, %s2076_s23  ;;  %v1022_v47 = vld [vmem:[#allocation2 + $0xc] sm:$0xf] }
 0x10e   : > { %v519_v51 = vrot.slane %v515_v49, 4  ;;  %v461_v33 = vpop.permute.xlu1 %460 }
 0x10f   : > { %v535_v52 = vpop.permute.xlu0 %534 }
 0x110   : > { %523 = vst [vmem:[#allocation3 + $0x180] sm:$0xf0] %v519_v51  ;;  %v538_v12 = vsel %vm536_vm13, %v533_v45, %v535_v52  ;;  %1120 = vrot.lane.b32.xlu1 %v2439_v11, %s2077_s25  ;;  %v1048_v52 = vld [vmem:[#allocation2 + $0xc] sm:$0xf] }
 0x111   : > { %542 = vst [vmem:[#allocation3 + $0x98] sm:$0xf] %v538_v12  ;;  %1188 = vrot.lane.b32.xlu0 %v2428_v61, %s2076_s23  ;;  %s1778_s23 = sshll.u32 %s217_s17, 4  ;;  %s1779_s23 = int_to_ptr.vmem [resolvable:$true] %s1778_s23 }
 0x112   : > { %v487_v53 = vpop.permute.xlu1 %486 }
 0x113   : > { %v463_v54 = vpop.permute.xlu0 %462 }
 0x114   : > { %v466_v57 = vsel %vm464_vm15, %v461_v33, %v463_v54  ;;  %1118 = vrot.lane.b32.xlu1 %v2428_v61, %s2077_s25 }
 0x115   : > { %v470_v58 = vsel %vm257_vm10, %v466_v57, 0.0  ;;  %1122 = vrot.lane.b32.xlu0 %v1114_v56, %s2077_s25 }
 0x116   : > { %v474_v23 = vrot.slane %v470_v58, 4  ;;  %v531_v60 = vpop.permute.xlu1 %530 }
 0x117   : > { %v489_v62 = vpop.permute.xlu0 %488  ;;  %v537_v63 = vsel %vm536_vm13, %v531_v60, %v533_v45  ;;  %vm444_vm13 = vcmask 367616  }
 0x118   : > { %478 = vst [vmem:[#allocation3 + $0x48] sm:$0xf0] %v474_v23  ;;  %v492_v0 = vsel %vm490_vm6, %v487_v53, %v489_v62  ;;  %v1411_v3 = vld [vmem:[#allocation3 + $0x98] sm:$0xff]  ;;  %541 = vst [vmem:[#allocation3 + $0x118] sm:$0xf] %v537_v63  ;;  %1148 = vrot.lane.b32.xlu1 %v1140_v59, %s2078_s26 }
 0x119   : > { %v496_v5 = vsel %vm265_vm3, %v492_v0, 0.0  ;;  %1496 = vmatprep.subr.mxu0 %v1411_v3  ;;  %1146 = vrot.lane.b32.xlu0 %v2439_v11, %s2078_s26  ;;  %v1002_v0 = vld [vmem:[#allocation2 + $0xc] sm:$0xf] }
 0x11a   : > { %498 = vst [vmem:[#allocation3 + $0x110] sm:$0xf] %v496_v5  ;;  %v485_v7 = vpop.permute.xlu1 %484  ;;  %v1397_v3 = vld [vmem:[%s2702_s1 + $0x8] sm:$0xff] }
 0x11b   : > { %v459_v9 = vpop.permute.xlu0 %458  ;;  %v491_v13 = vsel %vm490_vm6, %v485_v7, %v487_v53  ;;  %vm333_vm6 = vcmask 408576   ;;  %1540 = vmatprep.mubr.f32.mxu0 %v1397_v3 }
 0x11c   : > { %v465_v14 = vsel %vm464_vm15, %v459_v9, %v461_v33  ;;  %v495_v15 = vsel %vm264_vm2, %v491_v13, 0.0  ;;  %1076 = vrot.lane.b32.xlu1 %v1068_v6, %s2079_s30  ;;  %vm398_vm15 = vcmask 384000  }
 0x11d   : > { %v469_v16 = vsel %vm256_vm12, %v465_v14, 0.0  ;;  %497 = vst [vmem:[#allocation3 + $0x180] sm:$0xf] %v495_v15  ;;  %1074 = vrot.lane.b32.xlu0 %v2439_v11, %s2079_s30 }
 0x11e   : > { %v473_v4 = vrot.slane %v469_v16, 4  ;;  %v417_v18 = vpop.permute.xlu1 %416 }
 0x11f   : > { %v415_v19 = vpop.permute.xlu0 %414  ;;  %v1410_v20 = vld [vmem:[#allocation3 + $0x118] sm:$0xff] }
 0x120   : > { %477 = vst [vmem:[#allocation3 + $0x130] sm:$0xf0] %v473_v4  ;;  %v420_v22 = vsel %vm418_vm9, %v415_v19, %v417_v18  ;;  %1497 = vmatpush1.msra.mxu0 %v1410_v20  ;;  %1102 = vrot.lane.b32.xlu1 %v1094_v17, %s2080_s6  ;;  %v1464_v17 = vld [vmem:[%s2703_s2] sm:$0xff] }
 0x121   : > { %v424_v24 = vsel %vm291_vm1, %v420_v22, 0.0  ;;  %v1409_v25 = vld [vmem:[#allocation3 + $0x110] sm:$0xff]  ;;  %1100 = vrot.lane.b32.xlu0 %v2439_v11, %s2080_s6 }
 0x122   : > { %v428_v26 = vrot.slane %v424_v24, 4  ;;  %1498 = vmatprep.subr.mxu0 %v1409_v25  ;;  %v443_v27 = vpop.permute.xlu1 %442 }
 0x123   : > { %v441_v30 = vpop.permute.xlu0 %440 }
 0x124   : > { %432 = vst [vmem:[#allocation3 + $0x168] sm:$0xf0] %v428_v26  ;;  %v446_v31 = vsel %vm444_vm13, %v441_v30, %v443_v27  ;;  %1072 = vrot.lane.b32.xlu1 %v2428_v61, %s2079_s30  ;;  %v1408_v1 = vld [vmem:[#allocation3 + $0x180] sm:$0xff]  ;;  %s1776_s30 = scalar_lea.hbm %s2706_s5, %s1853_s16 }
 0x125   : > { %v450_v8 = vsel %vm299_vm8, %v446_v31, 0.0  ;;  %1499 = vmatpush1.msra.mxu0 %v1408_v1  ;;  %1144 = vrot.lane.b32.xlu0 %v2428_v61, %s2078_s26 }
 0x126   : > { %452 = vst [vmem:[#allocation3 + $0x48] sm:$0xf] %v450_v8  ;;  %v439_v32 = vpop.permute.xlu1 %438 }
 0x127   : > { %v445_v35 = vsel %vm444_vm13, %v439_v32, %v441_v30  ;;  %v413_v36 = vpop.permute.xlu0 %412  ;;  %vm380_vm13 = vcmask 392192  }
 0x128   : > { %v449_v39 = vsel %vm298_vm11, %v445_v35, 0.0  ;;  %v419_v40 = vsel %vm418_vm9, %v413_v36, %v415_v19  ;;  %1028 = vrot.lane.b32.xlu1 %v2439_v11, %s2081_s7  ;;  %vm359_vm9 = vcmask 400384   ;;  %v2084_v19 = vmov 0  }
 0x129   : > { %451 = vst [vmem:[#allocation3 + $0x130] sm:$0xf] %v449_v39  ;;  %v423_v41 = vsel %vm290_vm4, %v419_v40, 0.0  ;;  %1098 = vrot.lane.b32.xlu0 %v2428_v61, %s2080_s6  ;;  %1952 = vset.pattern.permute.xlu1 %v2084_v19  ;;  %s1764_s6 = scalar_lea.sflag [#allocation5], %s215_s14 }
 0x12a   : > { %v427_v45 = vrot.slane %v423_v41, 4  ;;  %v397_v46 = vpop.permute.xlu1 %396  ;;  %1951 = vset.pattern.permute.xlu0 %v2084_v19 }
 0x12b   : > { %v395_v48 = vpop.permute.xlu0 %394 }
 0x12c   : > { %431 = vst [vmem:[#allocation3 + $0x50] sm:$0xf0] %v427_v45  ;;  %v400_v49 = vsel %vm398_vm15, %v395_v48, %v397_v46  ;;  %1054 = vrot.lane.b32.xlu1 %v2439_v11, %s2082_s8 }
 0x12d   : > { %v404_v50 = vsel %vm283_vm14, %v400_v49, 0.0  ;;  %1030 = vrot.lane.b32.xlu0 %v1022_v47, %s2081_s7  ;;  %v1407_v51 = vld [vmem:[#allocation3 + $0x48] sm:$0xff] }
 0x12e   : > { %406 = vst [vmem:[#allocation3 + $0x168] sm:$0xf] %v404_v50  ;;  %v330_v33 = vpop.permute.xlu1 %329  ;;  %1500 = vmatprep.subr.mxu0 %v1407_v51 }
 0x12f   : > { %v393_v12 = vpop.permute.xlu0 %392 }
 0x130   : > { %v399_v53 = vsel %vm398_vm15, %v393_v12, %v395_v48  ;;  %1026 = vrot.lane.b32.xlu1 %v2428_v61, %s2081_s7  ;;  %v1406_v54 = vld [vmem:[#allocation3 + $0x130] sm:$0xff]  ;;  %vm313_vm15 = vcmask 416768   ;;  %s1973_s7 = scalar_lea.vmem %s1779_s23, 128 }
 0x131   : > { %v403_v56 = vsel %vm282_vm0, %v399_v53, 0.0  ;;  %1501 = vmatpush1.msra.mxu0 %v1406_v54  ;;  %1056 = vrot.lane.b32.xlu0 %v1048_v52, %s2082_s8  ;;  %p1974_p11 = scmp.ne.s32.totalorder %s1779_s23, %s1973_s7 }
 0x132   : > { %405 = vst [vmem:[#allocation3 + $0x50] sm:$0xf] %v403_v56  ;;  %v356_v57 = vpop.permute.xlu1 %355 }
 0x133   : > { %v332_v58 = vpop.permute.xlu0 %331  ;;  %p1975_p12 = pnand %p1974_p11, %p2154_p5 }
 0x134   : > { %v335_v23 = vsel %vm333_vm6, %v330_v33, %v332_v58  ;;  %1008 = vrot.lane.b32.xlu1 %v2439_v11, %s2083_s9  ;;  %v1972_v58 = vld [vmem:[#allocation3 + $0xa8] sm:$0xff] }
 0x135   : > { %v339_v59 = vsel %vm265_vm3, %v335_v23, 0.0  ;;  %1052 = vrot.lane.b32.xlu0 %v2428_v61, %s2082_s8  ;;  %v1405_v60 = vld [vmem:[#allocation3 + $0x168] sm:$0xff]  ;;  %p1976_p13 = pneg %p1975_p12  ;;  %s2085_s8 = smov [#allocation4]  }
 0x136   : > { %v343_v62 = vrot.slane %v339_v59, 4  ;;  %v328_v63 = vpop.permute.xlu1 %327  ;;  %1502 = vmatprep.subr.mxu0 %v1405_v60 }
 0x137   : > { %v334_v5 = vsel %vm333_vm6, %v328_v63, %v330_v33  ;;  %v358_v6 = vpop.permute.xlu0 %357  ;;  %vm1345_vm6 = vcmask 637952  }
 0x138   : > { %347 = vst [vmem:[#allocation3 + $0x1b0] sm:$0xf0] %v343_v62  ;;  %v338_v11 = vsel %vm264_vm2, %v334_v5, 0.0  ;;  %v361_v7 = vsel %vm359_vm9, %v356_v57, %v358_v6  ;;  %1006 = vrot.lane.b32.xlu1 %v2428_v61, %s2083_s9  ;;  %v1465_v61 = vld [vmem:[%s2703_s2 + $0x8] sm:$0xff] }
 0x139   : > { %v342_v9 = vrot.slane %v338_v11, 4  ;;  %v365_v13 = vsel %vm273_vm7, %v361_v7, 0.0  ;;  %1010 = vrot.lane.b32.xlu0 %v1002_v0, %s2083_s9  ;;  %v1404_v14 = vld [vmem:[#allocation3 + $0x50] sm:$0xff]  ;;  %s1977_s9 = sshll.u32 %s2085_s8, 4  ;;  %s1978_s9 = int_to_ptr.vmem [resolvable:$false] %s1977_s9 }
 0x13a   : > { %367 = vst [vmem:[#allocation3 + $0x18] sm:$0xf] %v365_v13  ;;  %v377_v15 = vpop.permute.xlu1 %376  ;;  %1503 = vmatpush1.msra.mxu0 %v1404_v14  ;;  %s1979_s22 = scalar_lea.vmem %s1978_s9, 256  ;;  %p1980_p0 = scmp.lt.s32.totalorder %s1779_s23, %s1978_s9 }
 0x13b   : > { %346 = vst [vmem:[#allocation3 + $0xb0] sm:$0xf0] %v342_v9  ;;  %v354_v16 = vpop.permute.xlu0 %353  ;;  %p1981_p1 = scmp.lt.s32.totalorder %s1979_s22, %s1973_s7 }
 0x13c   : > { %v360_v4 = vsel %vm359_vm9, %v354_v16, %v356_v57  ;;  %1473 = vperm.xlu1 %1952, %v1465_v61   ;;  %vm1371_vm9 = vcmask 629760  }
 0x13d   : > { %v364_v18 = vsel %vm272_vm5, %v360_v4, 0.0  ;;  %1468 = vperm.xlu0 %1951, %v1464_v17   ;;  %p1982_p2 = por %p1981_p1, %p1980_p0 }
 0x13e   : > { %366 = vst [vmem:[#allocation3 + $0xd8] sm:$0xf] %v364_v18  ;;  %v310_v20 = vpop.permute.xlu1 %309 }
 0x13f   : > { %v379_v22 = vpop.permute.xlu0 %378  ;;  %p1983_p3 = pnand %p1982_p2, %p1976_p13 }
 0x140   : > { %v382_v24 = vsel %vm380_vm13, %v377_v15, %v379_v22 }
 0x141   : > { %386 = vst [vmem:[#allocation3 + $0x18] sm:$0xf0] %v382_v24 }
 0x142   : > { %v375_v25 = vpop.permute.xlu1 %374 }
 0x143   : > { %v381_v26 = vsel %vm380_vm13, %v375_v25, %v377_v15  ;;  %v312_v27 = vpop.permute.xlu0 %311  ;;  %vm1325_vm13 = vcmask 646144  }
 0x144   : > { %385 = vst [vmem:[#allocation3 + $0xd8] sm:$0xf0] %v381_v26  ;;  %v315_v30 = vsel %vm313_vm15, %v310_v20, %v312_v27 }
 0x145   : > { %v319_v31 = vsel %vm257_vm10, %v315_v30, 0.0 }
 0x146   : > { %321 = vst [vmem:[#allocation3 + $0x1b0] sm:$0xf] %v319_v31  ;;  %v1342_v1 = vpop.permute.xlu1 %1341 }
 0x147   : > { %v308_v8 = vpop.permute.xlu0 %307 }
 0x148   : > { %v314_v32 = vsel %vm313_vm15, %v308_v8, %v310_v20  ;;  %v1403_v35 = vld [vmem:[#allocation3 + $0x18] sm:$0xff]  ;;  %vm1260_vm15 = vcmask 670720  }
 0x149   : > { %v318_v36 = vsel %vm256_vm12, %v314_v32, 0.0  ;;  %1504 = vmatprep.subr.mxu0 %v1403_v35 }
 0x14a   : > { %320 = vst [vmem:[#allocation3 + $0xb0] sm:$0xf] %v318_v36  ;;  %v1368_v39 = vpop.permute.xlu1 %1367 }
 0x14b   : > { %v1344_v40 = vpop.permute.xlu0 %1343  ;;  %v1402_v41 = vld [vmem:[#allocation3 + $0xd8] sm:$0xff] }
 0x14c   : > { %v1347_v45 = vsel %vm1345_vm6, %v1342_v1, %v1344_v40  ;;  %1505 = vmatpush1.msra.mxu0 %v1402_v41 }
 0x14d   : > { %v1351_v46 = vsel %vm291_vm1, %v1347_v45, 0.0  ;;  %v1401_v47 = vld [vmem:[#allocation3 + $0x1b0] sm:$0xff] }
 0x14e   : > { %v1355_v48 = vrot.slane %v1351_v46, 4  ;;  %v1340_v49 = vpop.permute.xlu1 %1339  ;;  %1506 = vmatprep.subr.mxu0 %v1401_v47 }
 0x14f   : > { %v1346_v50 = vsel %vm1345_vm6, %v1340_v49, %v1342_v1  ;;  %v1370_v51 = vpop.permute.xlu0 %1369  ;;  %vm1286_vm6 = vcmask 662528  }
 0x150   : > { %1359 = vst [vmem:[#allocation3 + $0xd0] sm:$0xf0] %v1355_v48  ;;  %v1350_v33 = vsel %vm290_vm4, %v1346_v50, 0.0  ;;  %v1373_v52 = vsel %vm1371_vm9, %v1368_v39, %v1370_v51 }
 0x151   : > { %v1354_v12 = vrot.slane %v1350_v33, 4  ;;  %v1377_v53 = vsel %vm299_vm8, %v1373_v52, 0.0  ;;  %v1400_v54 = vld [vmem:[#allocation3 + $0xb0] sm:$0xff] }
 0x152   : > { %1379 = vst [vmem:[#allocation3 + $0x88] sm:$0xf] %v1377_v53  ;;  %v1322_v56 = vpop.permute.xlu1 %1321  ;;  %1507 = vmatpush1.msra.mxu0 %v1400_v54 }
 0x153   : > { %1358 = vst [vmem:[#allocation3 + $0x1d8] sm:$0xf0] %v1354_v12  ;;  %v1366_v57 = vpop.permute.xlu0 %1365  ;;  %1508 = vmatprep.subr.mxu0 %v1972_v58 }
 0x154   : > { %v1372_v23 = vsel %vm1371_vm9, %v1366_v57, %v1368_v39  ;;  %1509 = vmatpush2.msra.mxu0 %v1972_v58  ;;  %vm1307_vm9 = vcmask 654336  }
 0x155   : > { %v1376_v59 = vsel %vm298_vm11, %v1372_v23, 0.0  ;;  %1510 = vmatprep.subr.mxu0 %v1972_v58 }
 0x156   : > { %1378 = vst [vmem:[#allocation3 + $0xb8] sm:$0xf] %v1376_v59  ;;  %v1320_v60 = vpop.permute.xlu1 %1319  ;;  %1511 = vmatpush2.msra.mxu0 %v1972_v58 }
 0x157   : > { %v1326_v62 = vsel %vm1325_vm13, %v1320_v60, %v1322_v56  ;;  %v1324_v63 = vpop.permute.xlu0 %1323  ;;  %1512 = vmatprep.subr.mxu0 %v1972_v58 }
 0x158   : > { %v1330_v0 = vsel %vm282_vm0, %v1326_v62, 0.0  ;;  %v1327_v3 = vsel %vm1325_vm13, %v1322_v56, %v1324_v63  ;;  %1513 = vmatpush2.msra.mxu0 %v1972_v58  ;;  %vm1214_vm13 = vcmask 760832  }
 0x159   : > { %1332 = vst [vmem:[#allocation3 + $0x1d8] sm:$0xf] %v1330_v0  ;;  %v1331_v5 = vsel %vm283_vm14, %v1327_v3, 0.0  ;;  %1514 = vmatprep.subr.mxu0 %v1972_v58  ;;  %v1449_v4 = vld [vmem:[#allocation3 + $0x88] sm:$0xff] }
 0x15a   : > { %1333 = vst [vmem:[#allocation3 + $0xd0] sm:$0xf] %v1331_v5  ;;  %v1259_v6 = vpop.permute.xlu1 %1258  ;;  %1515 = vmatpush2.msra.mxu0 %v1972_v58 }
 0x15b   : > { %v1257_v11 = vpop.permute.xlu0 %1256  ;;  %1516 = vmatprep.subr.mxu0 %v1972_v58 }
 0x15c   : > { %v1262_v7 = vsel %vm1260_vm15, %v1257_v11, %v1259_v6  ;;  %1517 = vmatpush2.msra.mxu0 %v1972_v58 }
 0x15d   : > { %v1266_v9 = vsel %vm265_vm3, %v1262_v7, 0.0  ;;  %1518 = vmatprep.subr.mxu0 %v1972_v58  ;;  %v1448_v61 = vld [vmem:[#allocation3 + $0xb8] sm:$0xff] }
 0x15e   : > { %v1270_v13 = vrot.slane %v1266_v9, 4  ;;  %v1285_v14 = vpop.permute.xlu1 %1284  ;;  %1519 = vmatpush2.msra.mxu0 %v1972_v58 }
 0x15f   : > { %v1283_v15 = vpop.permute.xlu0 %1282  ;;  %1520 = vmatprep.subr.mxu0 %v1972_v58 }
 0x160   : > { %1274 = vst [vmem:[#allocation3 + $0x78] sm:$0xf0] %v1270_v13  ;;  %v1288_v16 = vsel %vm1286_vm6, %v1283_v15, %v1285_v14  ;;  %1521 = vmatpush2.msra.mxu0 %v1972_v58  ;;  %v1446_v24 = vld [vmem:[#allocation3 + $0x1d8] sm:$0xff] }
 0x161   : > { %v1292_v17 = vsel %vm273_vm7, %v1288_v16, 0.0  ;;  %1522 = vmatprep.subr.mxu0 %v1449_v4  ;;  %v1447_v18 = vld [vmem:[#allocation3 + $0xd0] sm:$0xff] }
 0x162   : > { %1294 = vst [vmem:[#allocation3 + $0x90] sm:$0xf] %v1292_v17  ;;  %v1281_v19 = vpop.permute.xlu1 %1280  ;;  %1523 = vmatpush2.msra.mxu0 %v1448_v61 }
 0x163   : > { %v1287_v20 = vsel %vm1286_vm6, %v1281_v19, %v1283_v15  ;;  %v1255_v22 = vpop.permute.xlu0 %1254  ;;  %1524 = vmatprep.subr.mxu0 %v1447_v18  ;;  %vm1168_vm6 = vcmask 777216  }
 0x164   : > { %v1291_v25 = vsel %vm272_vm5, %v1287_v20, 0.0  ;;  %v1261_v26 = vsel %vm1260_vm15, %v1255_v22, %v1257_v11  ;;  %1525 = vmatpush2.msra.mxu0 %v1446_v24  ;;  %vm1240_vm15 = vcmask 678912  }
 0x165   : > { %1293 = vst [vmem:[#allocation3 + $0x70] sm:$0xf] %v1291_v25  ;;  %v1265_v27 = vsel %vm264_vm2, %v1261_v26, 0.0 }
 0x166   : > { %v1269_v30 = vrot.slane %v1265_v27, 4  ;;  %v1306_v31 = vpop.permute.xlu1 %1305 }
 0x167   : > { %v1304_v1 = vpop.permute.xlu0 %1303 }
 0x168   : > { %1273 = vst [vmem:[#allocation3 + $0xe8] sm:$0xf0] %v1269_v30  ;;  %v1309_v8 = vsel %vm1307_vm9, %v1304_v1, %v1306_v31 }
 0x169   : > { %1313 = vst [vmem:[#allocation3 + $0x90] sm:$0xf0] %v1309_v8 }
 0x16a   : > { %v1213_v32 = vpop.permute.xlu1 %1212 }
 0x16b   : > { %v1211_v35 = vpop.permute.xlu0 %1210 }
 0x16c   : > { %v1216_v36 = vsel %vm1214_vm13, %v1211_v35, %v1213_v32 }
 0x16d   : > { %v1220_v39 = vsel %vm299_vm8, %v1216_v36, 0.0 }
 0x16e   : > { %v1224_v40 = vrot.slane %v1220_v39, 4  ;;  %v1239_v41 = vpop.permute.xlu1 %1238 }
 0x16f   : > { %v1237_v45 = vpop.permute.xlu0 %1236 }
 0x170   : > { %1228 = vst [vmem:[#allocation3 + $0x1f0] sm:$0xf0] %v1224_v40  ;;  %v1242_v46 = vsel %vm1240_vm15, %v1237_v45, %v1239_v41  ;;  %v1445_v47 = vld [vmem:[#allocation3 + $0x90] sm:$0xff] }
 0x171   : > { %v1246_v48 = vsel %vm257_vm10, %v1242_v46, 0.0  ;;  %1526 = vmatprep.subr.mxu0 %v1445_v47 }
 0x172   : > { %1248 = vst [vmem:[#allocation3 + $0x78] sm:$0xf] %v1246_v48  ;;  %v1209_v49 = vpop.permute.xlu1 %1208 }
 0x173   : > { %v1215_v50 = vsel %vm1214_vm13, %v1209_v49, %v1211_v35  ;;  %v1302_v51 = vpop.permute.xlu0 %1301  ;;  %vm1124_vm13 = vcmask 793600  }
 0x174   : > { %v1219_v33 = vsel %vm298_vm11, %v1215_v50, 0.0  ;;  %v1308_v52 = vsel %vm1307_vm9, %v1302_v51, %v1304_v1  ;;  %vm1194_vm9 = vcmask 769024  }
 0x175   : > { %v1223_v12 = vrot.slane %v1219_v33, 4  ;;  %1312 = vst [vmem:[#allocation3 + $0x70] sm:$0xf0] %v1308_v52 }
 0x176   : > { %v1165_v53 = vpop.permute.xlu1 %1164 }
 0x177   : > { %1227 = vst [vmem:[#allocation3 + $0x1a0] sm:$0xf0] %v1223_v12  ;;  %v1235_v54 = vpop.permute.xlu0 %1234 }
 0x178   : > { %v1241_v56 = vsel %vm1240_vm15, %v1235_v54, %v1237_v45  ;;  %vm1150_vm15 = vcmask 785408  }
 0x179   : > { %v1245_v57 = vsel %vm256_vm12, %v1241_v56, 0.0  ;;  %v1443_v63 = vld [vmem:[#allocation3 + $0x78] sm:$0xff] }
 0x17a   : > { %1247 = vst [vmem:[#allocation3 + $0xe8] sm:$0xf] %v1245_v57  ;;  %v1191_v58 = vpop.permute.xlu1 %1190 }
 0x17b   : > { %v1167_v23 = vpop.permute.xlu0 %1166 }
 0x17c   : > { %v1170_v59 = vsel %vm1168_vm6, %v1165_v53, %v1167_v23  ;;  %v1444_v60 = vld [vmem:[#allocation3 + $0x70] sm:$0xff] }
 0x17d   : > { %v1174_v62 = vsel %vm283_vm14, %v1170_v59, 0.0  ;;  %1527 = vmatpush2.msra.mxu0 %v1444_v60 }
 0x17e   : > { %v1178_v0 = vrot.slane %v1174_v62, 4  ;;  %v1163_v3 = vpop.permute.xlu1 %1162  ;;  %1528 = vmatprep.subr.mxu0 %v1443_v63 }
 0x17f   : > { %v1169_v5 = vsel %vm1168_vm6, %v1163_v3, %v1165_v53  ;;  %v1193_v6 = vpop.permute.xlu0 %1192  ;;  %vm1078_vm6 = vcmask 809984  }
 0x180   : > { %1182 = vst [vmem:[#allocation3 + $0x128] sm:$0xf0] %v1178_v0  ;;  %v1173_v11 = vsel %vm282_vm0, %v1169_v5, 0.0  ;;  %v1196_v7 = vsel %vm1194_vm9, %v1191_v58, %v1193_v6 }
 0x181   : > { %v1177_v9 = vrot.slane %v1173_v11, 4  ;;  %v1200_v13 = vsel %vm291_vm1, %v1196_v7, 0.0  ;;  %v1442_v14 = vld [vmem:[#allocation3 + $0xe8] sm:$0xff] }
 0x182   : > { %1202 = vst [vmem:[#allocation3 + $0x1f0] sm:$0xf] %v1200_v13  ;;  %v1121_v15 = vpop.permute.xlu1 %1120  ;;  %1529 = vmatpush2.msra.mxu0 %v1442_v14 }
 0x183   : > { %1181 = vst [vmem:[#allocation3 + $0x20] sm:$0xf0] %v1177_v9  ;;  %v1189_v16 = vpop.permute.xlu0 %1188 }
 0x184   : > { %v1195_v4 = vsel %vm1194_vm9, %v1189_v16, %v1191_v58 }
 0x185   : > { %v1199_v17 = vsel %vm290_vm4, %v1195_v4, 0.0 }
 0x186   : > { %1201 = vst [vmem:[#allocation3 + $0x1a0] sm:$0xf] %v1199_v17  ;;  %v1119_v61 = vpop.permute.xlu1 %1118 }
 0x187   : > { %v1125_v18 = vsel %vm1124_vm13, %v1119_v61, %v1121_v15  ;;  %v1123_v19 = vpop.permute.xlu0 %1122  ;;  %v1396_v61 = vld [vmem:[%s2702_s1] sm:$0xff] }
 0x188   : > { %v1129_v20 = vsel %vm272_vm5, %v1125_v18, 0.0  ;;  %v1126_v22 = vsel %vm1124_vm13, %v1121_v15, %v1123_v19  ;;  %vm1104_vm5 = vcmask 801792  }
 0x189   : > { %v1133_v24 = vrot.slane %v1129_v20, 4  ;;  %v1130_v25 = vsel %vm273_vm7, %v1126_v22, 0.0  ;;  %v1441_v26 = vld [vmem:[#allocation3 + $0x1f0] sm:$0xff]  ;;  %vm1058_vm7 = vcmask 891904  }
 0x18a   : > { %v1134_v27 = vrot.slane %v1130_v25, 4  ;;  %v1149_v30 = vpop.permute.xlu1 %1148  ;;  %1530 = vmatprep.subr.mxu0 %v1441_v26 }
 0x18b   : > { %1137 = vst [vmem:[#allocation3 + $0x40] sm:$0xf0] %v1133_v24  ;;  %v1147_v31 = vpop.permute.xlu0 %1146 }
 0x18c   : > { %1138 = vst [vmem:[#allocation3 + $0x1f8] sm:$0xf0] %v1134_v27  ;;  %v1152_v1 = vsel %vm1150_vm15, %v1147_v31, %v1149_v30 }
 0x18d   : > { %1156 = vst [vmem:[#allocation3 + $0x128] sm:$0xf] %v1152_v1  ;;  %v1440_v8 = vld [vmem:[#allocation3 + $0x1a0] sm:$0xff] }
 0x18e   : > { %v1077_v42 = vpop.permute.xlu1 %1076  ;;  %1531 = vmatpush2.msra.mxu0 %v1440_v8 }
 0x18f   : > { %v1075_v32 = vpop.permute.xlu0 %1074 }
 0x190   : > { %v1080_v35 = vsel %vm1078_vm6, %v1075_v32, %v1077_v42 }
 0x191   : > { %v1084_v43 = vsel %vm257_vm10, %v1080_v35, 0.0  ;;  %vm1585_vm10 = vcmask 31744  }
 0x192   : > { %v1088_v36 = vrot.slane %v1084_v43, 4  ;;  %v1103_v39 = vpop.permute.xlu1 %1102 }
 0x193   : > { %v1101_v40 = vpop.permute.xlu0 %1100 }
 0x194   : > { %1092 = vst [vmem:[#allocation3 + $0xc8] sm:$0xf0] %v1088_v36  ;;  %v1106_v41 = vsel %vm1104_vm5, %v1101_v40, %v1103_v39  ;;  %v1439_v45 = vld [vmem:[#allocation3 + $0x128] sm:$0xff] }
 0x195   : > { %v1110_v46 = vsel %vm265_vm3, %v1106_v41, 0.0  ;;  %1532 = vmatprep.subr.mxu0 %v1439_v45  ;;  %vm1032_vm3 = vcmask 900096  }
 0x196   : > { %1112 = vst [vmem:[#allocation3 + $0x1f8] sm:$0xf] %v1110_v46  ;;  %v1073_v47 = vpop.permute.xlu1 %1072 }
 0x197   : > { %v1079_v48 = vsel %vm1078_vm6, %v1073_v47, %v1075_v32  ;;  %v1145_v49 = vpop.permute.xlu0 %1144 }
 0x198   : > { %v1083_v55 = vsel %vm256_vm12, %v1079_v48, 0.0  ;;  %v1151_v50 = vsel %vm1150_vm15, %v1145_v49, %v1147_v31 }
 0x199   : > { %v1087_v51 = vrot.slane %v1083_v55, 4  ;;  %1155 = vst [vmem:[#allocation3 + $0x20] sm:$0xf] %v1151_v50 }
 0x19a   : > { %v1029_v33 = vpop.permute.xlu1 %1028 }
 0x19b   : > { %1091 = vst [vmem:[#allocation3 + $0x100] sm:$0xf0] %v1087_v51  ;;  %v1099_v52 = vpop.permute.xlu0 %1098  ;;  %v1581_v51 = vld [vmem:[%s2704_s3] sm:$0xff] }
 0x19c   : > { %v1105_v12 = vsel %vm1104_vm5, %v1099_v52, %v1101_v40  ;;  %1859 = vmatprep.mubr.msk.f32.mxu1 %vm1585_vm10, %v1581_v51  ;;  %v1582_v52 = vld [vmem:[%s2704_s3 + $0x8] sm:$0xff] }
 0x19d   : > { %v1109_v38 = vsel %vm264_vm2, %v1105_v12, 0.0  ;;  %v1437_v58 = vld [vmem:[#allocation3 + $0x1f8] sm:$0xff]  ;;  %vm1012_vm2 = vcmask 908288  }
 0x19e   : > { %1111 = vst [vmem:[#allocation3 + $0x40] sm:$0xf] %v1109_v38  ;;  %v1055_v53 = vpop.permute.xlu1 %1054  ;;  %v1583_v38 = vld [vmem:[%s2705_s4] sm:$0xff] }
 0x19f   : > { %v1031_v54 = vpop.permute.xlu0 %1030 }
 0x1a0   : > { %v1034_v56 = vsel %vm1032_vm3, %v1029_v33, %v1031_v54  ;;  %v1438_v57 = vld [vmem:[#allocation3 + $0x20] sm:$0xff] }
 0x1a1   : > { %v1038_v10 = vsel %vm291_vm1, %v1034_v56, 0.0  ;;  %1533 = vmatpush2.msra.mxu0 %v1438_v57 }
 0x1a2   : > { %v1042_v23 = vrot.slane %v1038_v10, 4  ;;  %v1027_v59 = vpop.permute.xlu1 %1026  ;;  %1534 = vmatprep.subr.mxu0 %v1437_v58 }
 0x1a3   : > { %v1033_v60 = vsel %vm1032_vm3, %v1027_v59, %v1029_v33  ;;  %v1057_v62 = vpop.permute.xlu0 %1056 }
 0x1a4   : > { %1046 = vst [vmem:[#allocation3 + $0x1d0] sm:$0xf0] %v1042_v23  ;;  %v1037_v37 = vsel %vm290_vm4, %v1033_v60, 0.0  ;;  %v1060_v63 = vsel %vm1058_vm7, %v1055_v53, %v1057_v62 }
 0x1a5   : > { %v1041_v0 = vrot.slane %v1037_v37, 4  ;;  %v1064_v3 = vsel %vm299_vm8, %v1060_v63, 0.0  ;;  %v1436_v29 = vld [vmem:[#allocation3 + $0x40] sm:$0xff]  ;;  %vm1575_vm8 = vcmask 1043456  }
 0x1a6   : > { %1066 = vst [vmem:[#allocation3 + $0xc8] sm:$0xf] %v1064_v3  ;;  %v1009_v5 = vpop.permute.xlu1 %1008  ;;  %1535 = vmatpush2.msra.mxu0 %v1436_v29 }
 0x1a7   : > { %1045 = vst [vmem:[#allocation3 + $0x148] sm:$0xf0] %v1041_v0  ;;  %v1053_v6 = vpop.permute.xlu0 %1052 }
 0x1a8   : > { %v1059_v11 = vsel %vm1058_vm7, %v1053_v6, %v1055_v53  ;;  %v1584_v53 = vld [vmem:[%s2705_s4 + $0x8] sm:$0xff] }
 0x1a9   : > { %v1063_v7 = vsel %vm298_vm11, %v1059_v11, 0.0 }
 0x1aa   : > { %1065 = vst [vmem:[#allocation3 + $0x100] sm:$0xf] %v1063_v7  ;;  %v1007_v34 = vpop.permute.xlu1 %1006 }
 0x1ab   : > { %v1013_v9 = vsel %vm1012_vm2, %v1007_v34, %v1009_v5  ;;  %v1011_v13 = vpop.permute.xlu0 %1010 }
 0x1ac   : > { %v1017_v44 = vsel %vm282_vm0, %v1013_v9, 0.0  ;;  %v1014_v14 = vsel %vm1012_vm2, %v1009_v5, %v1011_v13 }
 0x1ad   : > { %1019 = vst [vmem:[#allocation3 + $0x148] sm:$0xf] %v1017_v44  ;;  %v1018_v15 = vsel %vm283_vm14, %v1014_v14, 0.0  ;;  %v1435_v16 = vld [vmem:[#allocation3 + $0xc8] sm:$0xff] }
 0x1ae   : > { %1020 = vst [vmem:[#allocation3 + $0x1d0] sm:$0xf] %v1018_v15  ;;  %1536 = vmatprep.subr.mxu0 %v1435_v16 }
 0x1b1   : > { %v1434_v4 = vld [vmem:[#allocation3 + $0x100] sm:$0xff] }
 0x1b2   : > { %1537 = vmatpush2.msra.mxu0 %v1434_v4 }
 0x1b4   : > { %v1432_v17 = vld [vmem:[#allocation3 + $0x148] sm:$0xff] }
 0x1b5   : > { %v1433_v2 = vld [vmem:[#allocation3 + $0x1d0] sm:$0xff] }
 0x1b6   : > { %1538 = vmatprep.subr.mxu0 %v1433_v2 }
 0x1b7   : > { %1539 = vmatpush2.msra.mxu0 %v1432_v17  ;;  %v1474_v24 = vpop.permute.xlu1 %1473 }
 0x1b8   : > { %1541 = vmatmul.mubr.f32.vlgmr.msra.gmra.mxu0 %v1396_v61  ;;  %v1469_v18 = vpop.permute.xlu0 %1468 }
 0x1b9   : > { %1546 = vmatprep.mubr.f32.mxu0 %v1399_v28 }
 0x1bc   : > { %1547 = vmatmul.mubr.f32.gmra.mxu0 %v1398_v21 }
 0x278   : > { %v1542_v19 = vpop.f32.mrf.mxu0 }
 0x279   : > { %v1543_v20 = vadd.f32 %v1542_v19, %v1469_v18 }
 0x27a   : > { %v1544_v22 = vpop.f32.mrf.mxu0 }
 0x27b   : > { %v2631_v25 = vmax.f32 %v1543_v20, 0.0  ;;  %v1545_v26 = vadd.f32 %v1544_v22, %v1469_v18 }
 0x27c   : > { %v1548_v27 = vpop.f32.mrf.mxu0 }
 0x27d   : > { %v1559_v30 = vrot.slane %v2631_v25, 4  ;;  %v2634_v31 = vmax.f32 %v1545_v26, 0.0  ;;  %v1549_v1 = vadd.f32 %v1548_v27, %v1474_v24 }
 0x27e   : > { %v1550_v8 = vpop.f32.mrf.mxu0 }
 0x27f   : > { %v1563_v42 = vadd.f32 %v1559_v30, %v2631_v25  ;;  %v1560_v32 = vrot.slane %v2634_v31, 4  ;;  %v2638_v35 = vmax.f32 %v1549_v1, 0.0  ;;  %v1551_v43 = vadd.f32 %v1550_v8, %v1474_v24 }
 0x281   : > { %v1564_v36 = vadd.f32 %v1560_v32, %v2634_v31  ;;  %v2641_v39 = vmax.f32 %v1551_v43, 0.0  ;;  %v1565_v40 = vadd.f32 %v1563_v42, %v2638_v35  ;;  %v1569_v41 = vrot.slane %v2638_v35, 4 }
 0x283   : > { %v1566_v45 = vadd.f32 %v1564_v36, %v2641_v39  ;;  %v1570_v46 = vrot.slane %v2641_v39, 4  ;;  %v1573_v47 = vadd.f32 %v1569_v41, %v1565_v40 }
 0x285   : > { %v1574_v48 = vadd.f32 %v1570_v46, %v1566_v45  ;;  %v1576_v49 = vsel %vm1575_vm8, %v1573_v47, 0.0 }
 0x287   : > { %v1577_v55 = vsel %vm1575_vm8, %v1574_v48, 0.0 }
 0x288   : > { %v1578_v50 = vadd.f32 %v1577_v55, %v1576_v49 }
 0x28a   : > { %1579 = vadd.xlane.f32.xlu1 %v1578_v50 }
 0x313   : > { %v1580_v33 = vpop.xlane.xlu1 %1579 }
 0x314   : > { %1857 = vmatprep.subr.msk.mxu1 %vm1575_vm8, %v1580_v33 }
 0x315   : > { %1858 = vmatpush3.msk.msra.mxu1 %vm1575_vm8, %v1580_v33 }
 0x316   : > { %1860 = vmatmul.mubr.msk.f32.vlgmr.msra.gmra.mxu1 %vm1585_vm10, %v1582_v52 }
 0x3d6   : > { %v1861_v12 = vpop.f32.mrf.mxu1 }
 0x3d7   : > { %v1667_v57 = vadd.f32 %v1861_v12, %v1584_v53 }
 0x3d8   : > { %v1661_v54 = vpop.f32.mrf.mxu1 }
 0x3d9   : > { %v1662_v56 = vadd.f32 %v1661_v54, %v1583_v38  ;;  %v1676_v23 = vrot.slane %v1667_v57, 4 }
 0x3db   : > { %v1671_v10 = vrot.slane %v1662_v56, 4 }
 0x3dd   : > { %v1673_v58 = vmax.f32 %v1662_v56, %v1671_v10 }
 0x3df   : > { %v1674_v59 = vmax.f32 %v1673_v58, %v1667_v57 }
 0x3e1   : > { %v1678_v60 = vmax.f32 %v1674_v59, %v1676_v23 }
 0x3e3   : > { %v1679_v62 = vsub.f32 %v1662_v56, %v1678_v60  ;;  %v1683_v37 = vrot.slane %v1678_v60, 4  ;;  %v1688_v0 = vsub.f32 %v1667_v57, %v1678_v60 }
 0x3e5   : > { %v1685_v63 = vsub.f32 %v1662_v56, %v1683_v37  ;;  %v1691_v3 = vsub.f32 %v1667_v57, %v1683_v37  ;;  %v1680_v29 = vmul.f32 1.442695, %v1679_v62  ;;  %v1689_v11 = vmul.f32 1.442695, %v1688_v0 }
 0x3e7   : > { %v1686_v5 = vmul.f32 1.442695, %v1685_v63  ;;  %v1692_v6 = vmul.f32 1.442695, %v1691_v3 }
 0x3e9   : > { %1962 = vpow2.f32 %v1686_v5 }
 0x3ea   : > { %1964 = vpow2.f32 %v1680_v29 }
 0x3eb   : > { %1966 = vpow2.f32 %v1692_v6 }
 0x3ec   : > { %1968 = vpow2.f32 %v1689_v11 }
 0x3f6   : > { %v1963_v7 = vpop.eup %1962 }
 0x3f7   : > { %v1965_v34 = vpop.eup %1964  ;;  %v1695_v9 = vrot.slane %v1963_v7, 4 }
 0x3f8   : > { %v1967_v13 = vpop.eup %1966 }
 0x3f9   : > { %v1697_v44 = vadd.f32 %v1965_v34, %v1695_v9  ;;  %v1969_v14 = vpop.eup %1968  ;;  %v1700_v16 = vrot.slane %v1967_v13, 4 }
 0x3fb   : > { %v1698_v15 = vadd.f32 %v1969_v14, %v1697_v44 }
 0x3fd   : > { %v1702_v4 = vadd.f32 %v1700_v16, %v1698_v15 }
 0x3ff   : > { %1970 = vrcp.f32 %v1702_v4 }
 0x40c   : > { %v1971_v17 = vpop.eup %1970 }
 0x40d   : > { %v1705_v2 = vmul.f32 %v1971_v17, %v1965_v34  ;;  %v1732_v61 = vmul.f32 %v1971_v17, %v1969_v14  ;;  %v1714_v28 = vrot.slane %v1971_v17, 4 }
 0x40f   : > { %1708 = vperm.xlu0 %1951, %v1705_v2   ;;  %v1716_v21 = vmul.f32 %v1963_v7, %v1714_v28  ;;  %v1742_v18 = vmul.f32 %v1967_v13, %v1714_v28 }
 0x413   : > { %1735 = vperm.xlu0 %1951, %v1732_v61  }
 0x417   : > { %1719 = vperm.xlu0 %1951, %v1716_v21  }
 0x41b   : > { %1745 = vperm.xlu0 %1951, %v1742_v18  }
 0x48a   : > { %v1709_v19 = vpop.permute.xlu0 %1708 }
 0x48b   : > { %v1711_v27 = vmul.f32 %v1709_v19, %v2631_v25  ;;  %v1712_v30 = vmul.f32 %v1709_v19, %v2634_v31 }
 0x48e   : > { %v1736_v20 = vpop.permute.xlu0 %1735 }
 0x48f   : > { %v1738_v42 = vmul.f32 %v1736_v20, %v2638_v35  ;;  %v1739_v32 = vmul.f32 %v1736_v20, %v2641_v39 }
 0x492   : > { %v1720_v22 = vpop.permute.xlu0 %1719 }
 0x493   : > { %v1722_v24 = vmul.f32 %v1720_v22, %v2631_v25  ;;  %v1723_v26 = vmul.f32 %v1720_v22, %v2634_v31 }
 0x495   : > { %v1726_v1 = vrot.slane %v1722_v24, 4  ;;  %v1727_v8 = vrot.slane %v1723_v26, 4 }
 0x496   : > { %v1746_v43 = vpop.permute.xlu0 %1745 }
 0x497   : > { %v1730_v36 = vadd.f32 %v1726_v1, %v1711_v27  ;;  %v1731_v40 = vadd.f32 %v1727_v8, %v1712_v30  ;;  %v1748_v41 = vmul.f32 %v1746_v43, %v2638_v35  ;;  %v1749_v45 = vmul.f32 %v1746_v43, %v2641_v39 }
 0x499   : > { %v1740_v46 = vadd.f32 %v1738_v42, %v1730_v36  ;;  %v1741_v47 = vadd.f32 %v1739_v32, %v1731_v40  ;;  %v1752_v48 = vrot.slane %v1748_v41, 4  ;;  %v1753_v25 = vrot.slane %v1749_v45, 4 }
 0x49b   : > { %v1756_v31 = vadd.f32 %v1752_v48, %v1740_v46  ;;  %v1757_v49 = vadd.f32 %v1753_v25, %v1741_v47 }
 0x49d   : > { %v1760_v55 = vcombine.low %v1756_v31, %v1757_v49 }
 0x49f   : > { %1762 = vst [vmem:[%s217_s17] sm:$0xff] %v1760_v55 }
 0x4a0   : > { %1986 = shalt.err (!%p1983_p3)
}
 0x4a1   : > { %s1987_s10 = scalar_lea.hbm %s1776_s30, 128  ;;  %s1991_s13 = scalar_lea.hbm %s2706_s5, 256 }
 0x4a2   : > { %p1988_p4 = scmp.ne.s32.totalorder %s1776_s30, %s1987_s10  ;;  %p1992_p9 = scmp.lt.s32.totalorder %s1776_s30, %s2706_s5 }
 0x4a3   : > { %p1993_p10 = scmp.lt.s32.totalorder %s1991_s13, %s1987_s10 }
 0x4a4   : > { %p1989_p7 = pnand %p1988_p4, %p2154_p5 }
 0x4a5   : > { %p1994_p11 = por %p1993_p10, %p1992_p9 }
 0x4a6   : > { %p1990_p8 = pneg %p1989_p7 }
 0x4a8   : > { %p1995_p12 = pnand %p1994_p11, %p1990_p8 }
 0x4aa   : > { %1998 = shalt.err (!%p1995_p12)
}
 0x4ab   : > { %1862 = dma.vmem_to_hbm [thread:$0]  (%p2154_p5), %s1779_s23, 128, %s1776_s30, %s1764_s6  }
 0x4ac PF: > { %p1868_p13 = scmp.ge.s32.totalorder %s2033_s21, 2  ;;  %s1790_s16 = sand.u32 1, %s2021_s18  }
 0x4ad   : > { %s1791_s17 = scalar_lea.sflag [#allocation5], %s1790_s16 }
 0x4ae   : > { %p1865_p0 = pnand %p1868_p13, %p2158_p6 }
 0x4b0   : > { %p1866_p1 = pneg %p1865_p0 }
 0x4b2   : > { %2016 = dma.done.wait (%p1866_p1), %s1791_s17, 128  }
 0x4b3   : > { %2018 = vsyncadd (%p1866_p1), %s1791_s17, 4294967168  ;;  %p15_p2 = scmp.ge.s32.totalorder %s2141_s24, 4   ;;  %s2709_s18 = smov %s2025_s19 }
 0x4b4   : > { %s2710_s19 = smov %s2029_s20  ;;  %s2711_s20 = smov %s2152_s27 }
 0x4b5   : > { %s2712_s21 = smov %s2141_s24  ;;  %17 = sbr.rel (!%p15_p2) target bundleno = 3 (0x3), region = 75 }
 0x4ba   :  { %1796 = vsyncpa [#allocation5], 1 }
 0x4bb   :  { %1798 = vsyncpa [#allocation5 + $0x1], 1 }

</bundles_post_ra>
